<compile_context>
chip_gen: v6e
topology: v6e:2x2x1
jax: 0.10.0
libtpu: 0.0.40
codegen_flags: <defaults>
</compile_context>

<pallas_src>
import jax
import jax.numpy as jnp
from jax.experimental import pallas as pl
from jax.experimental.pallas import tpu as pltpu

F_IN, F_HID, F_OUT = 8, 8, 1
LANE_BLOCK = 512  # batch lanes per grid step (>=512 keeps mem-bound kernels near roofline)


def bold_task_kernel(x_ref, w1_ref, b1_ref, w2_ref, b2_ref, o_ref):
    # x_ref : (F_IN, Bb)  VMEM  -- features on sublanes, batch on lanes
    # w1_ref: (F_IN, F_HID) SMEM, b1_ref: (F_HID,) SMEM
    # w2_ref: (F_HID,)      SMEM, b2_ref: (F_OUT,) SMEM
    # o_ref : (F_OUT, Bb) VMEM  -- lane-dense output
    x = x_ref[...].astype(jnp.float32)                    # (8, Bb), f32 compute path
    rows = [x[i:i + 1, :] for i in range(F_IN)]           # hoisted (1, Bb) row views

    y = None
    for j in range(F_HID):
        # hidden unit j: h_j = relu(sum_i w1[i, j] * x[i, :] + b1[j])  (VPU FMAs)
        h = rows[0] * w1_ref[0, j]
        for i in range(1, F_IN):
            h = h + rows[i] * w1_ref[i, j]
        h = jnp.maximum(h + b1_ref[j], 0.0)
        contrib = h * w2_ref[j]                            # fc2 contribution of unit j
        y = contrib if y is None else y + contrib
    y = y + b2_ref[0]
    o_ref[...] = y.astype(o_ref.dtype)                     # (1, Bb) unmasked store


def bold_task_forward(x, w1, b1, w2, b2, *, block_b=LANE_BLOCK):
    """x: (B, 8); w1: (8, 8) (in, out); b1: (8,); w2: (8, 1) (in, out); b2: (1,).
    Returns (B, 1), matching PyTorch BoldTask.forward."""
    B, f_in = x.shape
    assert f_in == F_IN, f_in

    # Lane-dense re-layout: batch -> lane axis.  (Wrapper-side transpose is cheap
    # layout plumbing; the kernel sees full-width vregs.)
    x_t = jnp.transpose(x).astype(jnp.float32)             # (8, B)
    padded_b = ((B + block_b - 1) // block_b) * block_b
    if padded_b != B:
        x_t = jnp.pad(x_t, ((0, 0), (0, padded_b - B)))    # zero pad: relu(b1) lanes, discarded
    grid = (padded_b // block_b,)

    smem_spec = pl.BlockSpec(memory_space=pltpu.MemorySpace.SMEM)

    out_t = pl.pallas_call(
        bold_task_kernel,
        out_shape=jax.ShapeDtypeStruct((F_OUT, padded_b), x.dtype),
        grid=grid,
        in_specs=[
            pl.BlockSpec((F_IN, block_b), lambda i: (0, i)),   # x, tiled along lanes
            smem_spec,                                         # w1 (8, 8) resident in SMEM
            smem_spec,                                         # b1 (8,)
            smem_spec,                                         # w2 (8,)
            smem_spec,                                         # b2 (1,)
        ],
        out_specs=pl.BlockSpec((F_OUT, block_b), lambda i: (0, i)),
        compiler_params=pltpu.CompilerParams(
            dimension_semantics=("parallel",),                 # shard batch axis on v7x's 2 TCs
        ),
    )(
        x_t,
        w1.astype(jnp.float32),
        b1.reshape(F_HID).astype(jnp.float32),
        w2.reshape(F_HID).astype(jnp.float32),
        b2.reshape(F_OUT).astype(jnp.float32),
    )

    # Back to PyTorch layout (B, 1).
    return out_t[:, :B].T


def init_params(key):
    """Deterministic init mimicking nn.Linear's U(-1/sqrt(fan_in), 1/sqrt(fan_in))."""
    k1, k2, k3, k4 = jax.random.split(key, 4)
    bound1 = 1.0 / jnp.sqrt(8.0)
    w1 = jax.random.uniform(k1, (F_IN, F_HID), jnp.float32, -bound1, bound1)   # (in, out)
    b1 = jax.random.uniform(k2, (F_HID,), jnp.float32, -bound1, bound1)
    bound2 = 1.0 / jnp.sqrt(8.0)
    w2 = jax.random.uniform(k3, (F_HID, F_OUT), jnp.float32, -bound2, bound2)  # (in, out)
    b2 = jax.random.uniform(k4, (F_OUT,), jnp.float32, -bound2, bound2)
    return w1, b1, w2, b2


def reference_forward(x, w1, b1, w2, b2):
    h = jnp.maximum(x @ w1 + b1, 0.0)
    return h @ w2 + b2


if __name__ == "__main__":
    key = jax.random.PRNGKey(0)
    kx, kx2, kp = jax.random.split(key, 3)
    w1, b1, w2, b2 = init_params(kp)

    # Small batch (matches module usage).
    B = 8
    x = jax.random.normal(kx, (B, F_IN), jnp.float32)
    out = bold_task_forward(x, w1, b1, w2, b2)
    jax.block_until_ready(out)
    ref = reference_forward(x, w1, b1, w2, b2)
    assert out.shape == (B, F_OUT), out.shape
    assert jnp.allclose(out, ref, atol=1e-5, rtol=1e-5), "mismatch vs reference (B=8)"

    # Larger batch to exercise lane padding + multi-step batch grid (2 grid steps).
    B2 = 600
    x2 = jax.random.normal(kx2, (B2, F_IN), jnp.float32)
    out2 = bold_task_forward(x2, w1, b1, w2, b2)
    jax.block_until_ready(out2)
    ref2 = reference_forward(x2, w1, b1, w2, b2)
    assert out2.shape == (B2, F_OUT), out2.shape
    assert jnp.allclose(out2, ref2, atol=1e-5, rtol=1e-5), "mismatch vs reference (B=600)"

    print("KERNEL_OK")
</pallas_src>

<mosaic_0001>
module attributes {stable_mosaic.version = 11 : i64} {
  func.func @bold_task_kernel(%arg0: i32, %arg1: memref<8x512xf32, #tpu.memory_space<vmem>>, %arg2: memref<8x8xf32, #tpu.memory_space<smem>>, %arg3: memref<8xf32, #tpu.memory_space<smem>>, %arg4: memref<8xf32, #tpu.memory_space<smem>>, %arg5: memref<1xf32, #tpu.memory_space<smem>>, %arg6: memref<1x512xf32, #tpu.memory_space<vmem>>) attributes {dimension_semantics = [#tpu.dimension_semantics<parallel>], iteration_bounds = array<i64: 1>, scalar_prefetch = 0 : i64, scratch_operands = 0 : i64, tpu.core_type = #tpu.core_type<tc>, window_params = [{transform_indices = @transform_0, window_bounds = array<i64: 8, 512>}, {transform_indices = @transform_1, window_bounds = array<i64: 8, 8>}, {transform_indices = @transform_2, window_bounds = array<i64: 8>}, {transform_indices = @transform_3, window_bounds = array<i64: 8>}, {transform_indices = @transform_4, window_bounds = array<i64: 1>}, {transform_indices = @transform_5, window_bounds = array<i64: 1, 512>}]} {
    %c0 = arith.constant 0 : index
    %c0_0 = arith.constant 0 : index
    %0 = vector.load %arg1[%c0, %c0_0] : memref<8x512xf32, #tpu.memory_space<vmem>>, vector<8x512xf32>
    %1 = vector.extract_strided_slice %0 {offsets = [0, 0], sizes = [1, 512], strides = [1, 1]} : vector<8x512xf32> to vector<1x512xf32>
    %2 = vector.extract_strided_slice %0 {offsets = [1, 0], sizes = [1, 512], strides = [1, 1]} : vector<8x512xf32> to vector<1x512xf32>
    %3 = vector.extract_strided_slice %0 {offsets = [2, 0], sizes = [1, 512], strides = [1, 1]} : vector<8x512xf32> to vector<1x512xf32>
    %4 = vector.extract_strided_slice %0 {offsets = [3, 0], sizes = [1, 512], strides = [1, 1]} : vector<8x512xf32> to vector<1x512xf32>
    %5 = vector.extract_strided_slice %0 {offsets = [4, 0], sizes = [1, 512], strides = [1, 1]} : vector<8x512xf32> to vector<1x512xf32>
    %6 = vector.extract_strided_slice %0 {offsets = [5, 0], sizes = [1, 512], strides = [1, 1]} : vector<8x512xf32> to vector<1x512xf32>
    %7 = vector.extract_strided_slice %0 {offsets = [6, 0], sizes = [1, 512], strides = [1, 1]} : vector<8x512xf32> to vector<1x512xf32>
    %8 = vector.extract_strided_slice %0 {offsets = [7, 0], sizes = [1, 512], strides = [1, 1]} : vector<8x512xf32> to vector<1x512xf32>
    %c0_1 = arith.constant 0 : index
    %c0_2 = arith.constant 0 : index
    %9 = memref.load %arg2[%c0_1, %c0_2] : memref<8x8xf32, #tpu.memory_space<smem>>
    %10 = vector.broadcast %9 : f32 to vector<1x512xf32>
    %11 = arith.mulf %1, %10 : vector<1x512xf32>
    %c1 = arith.constant 1 : index
    %c0_3 = arith.constant 0 : index
    %12 = memref.load %arg2[%c1, %c0_3] : memref<8x8xf32, #tpu.memory_space<smem>>
    %13 = vector.broadcast %12 : f32 to vector<1x512xf32>
    %14 = arith.mulf %2, %13 : vector<1x512xf32>
    %15 = arith.addf %11, %14 : vector<1x512xf32>
    %c2 = arith.constant 2 : index
    %c0_4 = arith.constant 0 : index
    %16 = memref.load %arg2[%c2, %c0_4] : memref<8x8xf32, #tpu.memory_space<smem>>
    %17 = vector.broadcast %16 : f32 to vector<1x512xf32>
    %18 = arith.mulf %3, %17 : vector<1x512xf32>
    %19 = arith.addf %15, %18 : vector<1x512xf32>
    %c3 = arith.constant 3 : index
    %c0_5 = arith.constant 0 : index
    %20 = memref.load %arg2[%c3, %c0_5] : memref<8x8xf32, #tpu.memory_space<smem>>
    %21 = vector.broadcast %20 : f32 to vector<1x512xf32>
    %22 = arith.mulf %4, %21 : vector<1x512xf32>
    %23 = arith.addf %19, %22 : vector<1x512xf32>
    %c4 = arith.constant 4 : index
    %c0_6 = arith.constant 0 : index
    %24 = memref.load %arg2[%c4, %c0_6] : memref<8x8xf32, #tpu.memory_space<smem>>
    %25 = vector.broadcast %24 : f32 to vector<1x512xf32>
    %26 = arith.mulf %5, %25 : vector<1x512xf32>
    %27 = arith.addf %23, %26 : vector<1x512xf32>
    %c5 = arith.constant 5 : index
    %c0_7 = arith.constant 0 : index
    %28 = memref.load %arg2[%c5, %c0_7] : memref<8x8xf32, #tpu.memory_space<smem>>
    %29 = vector.broadcast %28 : f32 to vector<1x512xf32>
    %30 = arith.mulf %6, %29 : vector<1x512xf32>
    %31 = arith.addf %27, %30 : vector<1x512xf32>
    %c6 = arith.constant 6 : index
    %c0_8 = arith.constant 0 : index
    %32 = memref.load %arg2[%c6, %c0_8] : memref<8x8xf32, #tpu.memory_space<smem>>
    %33 = vector.broadcast %32 : f32 to vector<1x512xf32>
    %34 = arith.mulf %7, %33 : vector<1x512xf32>
    %35 = arith.addf %31, %34 : vector<1x512xf32>
    %c7 = arith.constant 7 : index
    %c0_9 = arith.constant 0 : index
    %36 = memref.load %arg2[%c7, %c0_9] : memref<8x8xf32, #tpu.memory_space<smem>>
    %37 = vector.broadcast %36 : f32 to vector<1x512xf32>
    %38 = arith.mulf %8, %37 : vector<1x512xf32>
    %39 = arith.addf %35, %38 : vector<1x512xf32>
    %c0_10 = arith.constant 0 : index
    %40 = memref.load %arg3[%c0_10] : memref<8xf32, #tpu.memory_space<smem>>
    %41 = vector.broadcast %40 : f32 to vector<1x512xf32>
    %42 = arith.addf %39, %41 : vector<1x512xf32>
    %cst = arith.constant 0.000000e+00 : f32
    %43 = vector.broadcast %cst : f32 to vector<1x512xf32>
    %44 = arith.maximumf %42, %43 : vector<1x512xf32>
    %c0_11 = arith.constant 0 : index
    %45 = memref.load %arg4[%c0_11] : memref<8xf32, #tpu.memory_space<smem>>
    %46 = vector.broadcast %45 : f32 to vector<1x512xf32>
    %47 = arith.mulf %44, %46 : vector<1x512xf32>
    %c0_12 = arith.constant 0 : index
    %c1_13 = arith.constant 1 : index
    %48 = memref.load %arg2[%c0_12, %c1_13] : memref<8x8xf32, #tpu.memory_space<smem>>
    %49 = vector.broadcast %48 : f32 to vector<1x512xf32>
    %50 = arith.mulf %1, %49 : vector<1x512xf32>
    %c1_14 = arith.constant 1 : index
    %c1_15 = arith.constant 1 : index
    %51 = memref.load %arg2[%c1_14, %c1_15] : memref<8x8xf32, #tpu.memory_space<smem>>
    %52 = vector.broadcast %51 : f32 to vector<1x512xf32>
    %53 = arith.mulf %2, %52 : vector<1x512xf32>
    %54 = arith.addf %50, %53 : vector<1x512xf32>
    %c2_16 = arith.constant 2 : index
    %c1_17 = arith.constant 1 : index
    %55 = memref.load %arg2[%c2_16, %c1_17] : memref<8x8xf32, #tpu.memory_space<smem>>
    %56 = vector.broadcast %55 : f32 to vector<1x512xf32>
    %57 = arith.mulf %3, %56 : vector<1x512xf32>
    %58 = arith.addf %54, %57 : vector<1x512xf32>
    %c3_18 = arith.constant 3 : index
    %c1_19 = arith.constant 1 : index
    %59 = memref.load %arg2[%c3_18, %c1_19] : memref<8x8xf32, #tpu.memory_space<smem>>
    %60 = vector.broadcast %59 : f32 to vector<1x512xf32>
    %61 = arith.mulf %4, %60 : vector<1x512xf32>
    %62 = arith.addf %58, %61 : vector<1x512xf32>
    %c4_20 = arith.constant 4 : index
    %c1_21 = arith.constant 1 : index
    %63 = memref.load %arg2[%c4_20, %c1_21] : memref<8x8xf32, #tpu.memory_space<smem>>
    %64 = vector.broadcast %63 : f32 to vector<1x512xf32>
    %65 = arith.mulf %5, %64 : vector<1x512xf32>
    %66 = arith.addf %62, %65 : vector<1x512xf32>
    %c5_22 = arith.constant 5 : index
    %c1_23 = arith.constant 1 : index
    %67 = memref.load %arg2[%c5_22, %c1_23] : memref<8x8xf32, #tpu.memory_space<smem>>
    %68 = vector.broadcast %67 : f32 to vector<1x512xf32>
    %69 = arith.mulf %6, %68 : vector<1x512xf32>
    %70 = arith.addf %66, %69 : vector<1x512xf32>
    %c6_24 = arith.constant 6 : index
    %c1_25 = arith.constant 1 : index
    %71 = memref.load %arg2[%c6_24, %c1_25] : memref<8x8xf32, #tpu.memory_space<smem>>
    %72 = vector.broadcast %71 : f32 to vector<1x512xf32>
    %73 = arith.mulf %7, %72 : vector<1x512xf32>
    %74 = arith.addf %70, %73 : vector<1x512xf32>
    %c7_26 = arith.constant 7 : index
    %c1_27 = arith.constant 1 : index
    %75 = memref.load %arg2[%c7_26, %c1_27] : memref<8x8xf32, #tpu.memory_space<smem>>
    %76 = vector.broadcast %75 : f32 to vector<1x512xf32>
    %77 = arith.mulf %8, %76 : vector<1x512xf32>
    %78 = arith.addf %74, %77 : vector<1x512xf32>
    %c1_28 = arith.constant 1 : index
    %79 = memref.load %arg3[%c1_28] : memref<8xf32, #tpu.memory_space<smem>>
    %80 = vector.broadcast %79 : f32 to vector<1x512xf32>
    %81 = arith.addf %78, %80 : vector<1x512xf32>
    %cst_29 = arith.constant 0.000000e+00 : f32
    %82 = vector.broadcast %cst_29 : f32 to vector<1x512xf32>
    %83 = arith.maximumf %81, %82 : vector<1x512xf32>
    %c1_30 = arith.constant 1 : index
    %84 = memref.load %arg4[%c1_30] : memref<8xf32, #tpu.memory_space<smem>>
    %85 = vector.broadcast %84 : f32 to vector<1x512xf32>
    %86 = arith.mulf %83, %85 : vector<1x512xf32>
    %87 = arith.addf %47, %86 : vector<1x512xf32>
    %c0_31 = arith.constant 0 : index
    %c2_32 = arith.constant 2 : index
    %88 = memref.load %arg2[%c0_31, %c2_32] : memref<8x8xf32, #tpu.memory_space<smem>>
    %89 = vector.broadcast %88 : f32 to vector<1x512xf32>
    %90 = arith.mulf %1, %89 : vector<1x512xf32>
    %c1_33 = arith.constant 1 : index
    %c2_34 = arith.constant 2 : index
    %91 = memref.load %arg2[%c1_33, %c2_34] : memref<8x8xf32, #tpu.memory_space<smem>>
    %92 = vector.broadcast %91 : f32 to vector<1x512xf32>
    %93 = arith.mulf %2, %92 : vector<1x512xf32>
    %94 = arith.addf %90, %93 : vector<1x512xf32>
    %c2_35 = arith.constant 2 : index
    %c2_36 = arith.constant 2 : index
    %95 = memref.load %arg2[%c2_35, %c2_36] : memref<8x8xf32, #tpu.memory_space<smem>>
    %96 = vector.broadcast %95 : f32 to vector<1x512xf32>
    %97 = arith.mulf %3, %96 : vector<1x512xf32>
    %98 = arith.addf %94, %97 : vector<1x512xf32>
    %c3_37 = arith.constant 3 : index
    %c2_38 = arith.constant 2 : index
    %99 = memref.load %arg2[%c3_37, %c2_38] : memref<8x8xf32, #tpu.memory_space<smem>>
    %100 = vector.broadcast %99 : f32 to vector<1x512xf32>
    %101 = arith.mulf %4, %100 : vector<1x512xf32>
    %102 = arith.addf %98, %101 : vector<1x512xf32>
    %c4_39 = arith.constant 4 : index
    %c2_40 = arith.constant 2 : index
    %103 = memref.load %arg2[%c4_39, %c2_40] : memref<8x8xf32, #tpu.memory_space<smem>>
    %104 = vector.broadcast %103 : f32 to vector<1x512xf32>
    %105 = arith.mulf %5, %104 : vector<1x512xf32>
    %106 = arith.addf %102, %105 : vector<1x512xf32>
    %c5_41 = arith.constant 5 : index
    %c2_42 = arith.constant 2 : index
    %107 = memref.load %arg2[%c5_41, %c2_42] : memref<8x8xf32, #tpu.memory_space<smem>>
    %108 = vector.broadcast %107 : f32 to vector<1x512xf32>
    %109 = arith.mulf %6, %108 : vector<1x512xf32>
    %110 = arith.addf %106, %109 : vector<1x512xf32>
    %c6_43 = arith.constant 6 : index
    %c2_44 = arith.constant 2 : index
    %111 = memref.load %arg2[%c6_43, %c2_44] : memref<8x8xf32, #tpu.memory_space<smem>>
    %112 = vector.broadcast %111 : f32 to vector<1x512xf32>
    %113 = arith.mulf %7, %112 : vector<1x512xf32>
    %114 = arith.addf %110, %113 : vector<1x512xf32>
    %c7_45 = arith.constant 7 : index
    %c2_46 = arith.constant 2 : index
    %115 = memref.load %arg2[%c7_45, %c2_46] : memref<8x8xf32, #tpu.memory_space<smem>>
    %116 = vector.broadcast %115 : f32 to vector<1x512xf32>
    %117 = arith.mulf %8, %116 : vector<1x512xf32>
    %118 = arith.addf %114, %117 : vector<1x512xf32>
    %c2_47 = arith.constant 2 : index
    %119 = memref.load %arg3[%c2_47] : memref<8xf32, #tpu.memory_space<smem>>
    %120 = vector.broadcast %119 : f32 to vector<1x512xf32>
    %121 = arith.addf %118, %120 : vector<1x512xf32>
    %cst_48 = arith.constant 0.000000e+00 : f32
    %122 = vector.broadcast %cst_48 : f32 to vector<1x512xf32>
    %123 = arith.maximumf %121, %122 : vector<1x512xf32>
    %c2_49 = arith.constant 2 : index
    %124 = memref.load %arg4[%c2_49] : memref<8xf32, #tpu.memory_space<smem>>
    %125 = vector.broadcast %124 : f32 to vector<1x512xf32>
    %126 = arith.mulf %123, %125 : vector<1x512xf32>
    %127 = arith.addf %87, %126 : vector<1x512xf32>
    %c0_50 = arith.constant 0 : index
    %c3_51 = arith.constant 3 : index
    %128 = memref.load %arg2[%c0_50, %c3_51] : memref<8x8xf32, #tpu.memory_space<smem>>
    %129 = vector.broadcast %128 : f32 to vector<1x512xf32>
    %130 = arith.mulf %1, %129 : vector<1x512xf32>
    %c1_52 = arith.constant 1 : index
    %c3_53 = arith.constant 3 : index
    %131 = memref.load %arg2[%c1_52, %c3_53] : memref<8x8xf32, #tpu.memory_space<smem>>
    %132 = vector.broadcast %131 : f32 to vector<1x512xf32>
    %133 = arith.mulf %2, %132 : vector<1x512xf32>
    %134 = arith.addf %130, %133 : vector<1x512xf32>
    %c2_54 = arith.constant 2 : index
    %c3_55 = arith.constant 3 : index
    %135 = memref.load %arg2[%c2_54, %c3_55] : memref<8x8xf32, #tpu.memory_space<smem>>
    %136 = vector.broadcast %135 : f32 to vector<1x512xf32>
    %137 = arith.mulf %3, %136 : vector<1x512xf32>
    %138 = arith.addf %134, %137 : vector<1x512xf32>
    %c3_56 = arith.constant 3 : index
    %c3_57 = arith.constant 3 : index
    %139 = memref.load %arg2[%c3_56, %c3_57] : memref<8x8xf32, #tpu.memory_space<smem>>
    %140 = vector.broadcast %139 : f32 to vector<1x512xf32>
    %141 = arith.mulf %4, %140 : vector<1x512xf32>
    %142 = arith.addf %138, %141 : vector<1x512xf32>
    %c4_58 = arith.constant 4 : index
    %c3_59 = arith.constant 3 : index
    %143 = memref.load %arg2[%c4_58, %c3_59] : memref<8x8xf32, #tpu.memory_space<smem>>
    %144 = vector.broadcast %143 : f32 to vector<1x512xf32>
    %145 = arith.mulf %5, %144 : vector<1x512xf32>
    %146 = arith.addf %142, %145 : vector<1x512xf32>
    %c5_60 = arith.constant 5 : index
    %c3_61 = arith.constant 3 : index
    %147 = memref.load %arg2[%c5_60, %c3_61] : memref<8x8xf32, #tpu.memory_space<smem>>
    %148 = vector.broadcast %147 : f32 to vector<1x512xf32>
    %149 = arith.mulf %6, %148 : vector<1x512xf32>
    %150 = arith.addf %146, %149 : vector<1x512xf32>
    %c6_62 = arith.constant 6 : index
    %c3_63 = arith.constant 3 : index
    %151 = memref.load %arg2[%c6_62, %c3_63] : memref<8x8xf32, #tpu.memory_space<smem>>
    %152 = vector.broadcast %151 : f32 to vector<1x512xf32>
    %153 = arith.mulf %7, %152 : vector<1x512xf32>
    %154 = arith.addf %150, %153 : vector<1x512xf32>
    %c7_64 = arith.constant 7 : index
    %c3_65 = arith.constant 3 : index
    %155 = memref.load %arg2[%c7_64, %c3_65] : memref<8x8xf32, #tpu.memory_space<smem>>
    %156 = vector.broadcast %155 : f32 to vector<1x512xf32>
    %157 = arith.mulf %8, %156 : vector<1x512xf32>
    %158 = arith.addf %154, %157 : vector<1x512xf32>
    %c3_66 = arith.constant 3 : index
    %159 = memref.load %arg3[%c3_66] : memref<8xf32, #tpu.memory_space<smem>>
    %160 = vector.broadcast %159 : f32 to vector<1x512xf32>
    %161 = arith.addf %158, %160 : vector<1x512xf32>
    %cst_67 = arith.constant 0.000000e+00 : f32
    %162 = vector.broadcast %cst_67 : f32 to vector<1x512xf32>
    %163 = arith.maximumf %161, %162 : vector<1x512xf32>
    %c3_68 = arith.constant 3 : index
    %164 = memref.load %arg4[%c3_68] : memref<8xf32, #tpu.memory_space<smem>>
    %165 = vector.broadcast %164 : f32 to vector<1x512xf32>
    %166 = arith.mulf %163, %165 : vector<1x512xf32>
    %167 = arith.addf %127, %166 : vector<1x512xf32>
    %c0_69 = arith.constant 0 : index
    %c4_70 = arith.constant 4 : index
    %168 = memref.load %arg2[%c0_69, %c4_70] : memref<8x8xf32, #tpu.memory_space<smem>>
    %169 = vector.broadcast %168 : f32 to vector<1x512xf32>
    %170 = arith.mulf %1, %169 : vector<1x512xf32>
    %c1_71 = arith.constant 1 : index
    %c4_72 = arith.constant 4 : index
    %171 = memref.load %arg2[%c1_71, %c4_72] : memref<8x8xf32, #tpu.memory_space<smem>>
    %172 = vector.broadcast %171 : f32 to vector<1x512xf32>
    %173 = arith.mulf %2, %172 : vector<1x512xf32>
    %174 = arith.addf %170, %173 : vector<1x512xf32>
    %c2_73 = arith.constant 2 : index
    %c4_74 = arith.constant 4 : index
    %175 = memref.load %arg2[%c2_73, %c4_74] : memref<8x8xf32, #tpu.memory_space<smem>>
    %176 = vector.broadcast %175 : f32 to vector<1x512xf32>
    %177 = arith.mulf %3, %176 : vector<1x512xf32>
    %178 = arith.addf %174, %177 : vector<1x512xf32>
    %c3_75 = arith.constant 3 : index
    %c4_76 = arith.constant 4 : index
    %179 = memref.load %arg2[%c3_75, %c4_76] : memref<8x8xf32, #tpu.memory_space<smem>>
    %180 = vector.broadcast %179 : f32 to vector<1x512xf32>
    %181 = arith.mulf %4, %180 : vector<1x512xf32>
    %182 = arith.addf %178, %181 : vector<1x512xf32>
    %c4_77 = arith.constant 4 : index
    %c4_78 = arith.constant 4 : index
    %183 = memref.load %arg2[%c4_77, %c4_78] : memref<8x8xf32, #tpu.memory_space<smem>>
    %184 = vector.broadcast %183 : f32 to vector<1x512xf32>
    %185 = arith.mulf %5, %184 : vector<1x512xf32>
    %186 = arith.addf %182, %185 : vector<1x512xf32>
    %c5_79 = arith.constant 5 : index
    %c4_80 = arith.constant 4 : index
    %187 = memref.load %arg2[%c5_79, %c4_80] : memref<8x8xf32, #tpu.memory_space<smem>>
    %188 = vector.broadcast %187 : f32 to vector<1x512xf32>
    %189 = arith.mulf %6, %188 : vector<1x512xf32>
    %190 = arith.addf %186, %189 : vector<1x512xf32>
    %c6_81 = arith.constant 6 : index
    %c4_82 = arith.constant 4 : index
    %191 = memref.load %arg2[%c6_81, %c4_82] : memref<8x8xf32, #tpu.memory_space<smem>>
    %192 = vector.broadcast %191 : f32 to vector<1x512xf32>
    %193 = arith.mulf %7, %192 : vector<1x512xf32>
    %194 = arith.addf %190, %193 : vector<1x512xf32>
    %c7_83 = arith.constant 7 : index
    %c4_84 = arith.constant 4 : index
    %195 = memref.load %arg2[%c7_83, %c4_84] : memref<8x8xf32, #tpu.memory_space<smem>>
    %196 = vector.broadcast %195 : f32 to vector<1x512xf32>
    %197 = arith.mulf %8, %196 : vector<1x512xf32>
    %198 = arith.addf %194, %197 : vector<1x512xf32>
    %c4_85 = arith.constant 4 : index
    %199 = memref.load %arg3[%c4_85] : memref<8xf32, #tpu.memory_space<smem>>
    %200 = vector.broadcast %199 : f32 to vector<1x512xf32>
    %201 = arith.addf %198, %200 : vector<1x512xf32>
    %cst_86 = arith.constant 0.000000e+00 : f32
    %202 = vector.broadcast %cst_86 : f32 to vector<1x512xf32>
    %203 = arith.maximumf %201, %202 : vector<1x512xf32>
    %c4_87 = arith.constant 4 : index
    %204 = memref.load %arg4[%c4_87] : memref<8xf32, #tpu.memory_space<smem>>
    %205 = vector.broadcast %204 : f32 to vector<1x512xf32>
    %206 = arith.mulf %203, %205 : vector<1x512xf32>
    %207 = arith.addf %167, %206 : vector<1x512xf32>
    %c0_88 = arith.constant 0 : index
    %c5_89 = arith.constant 5 : index
    %208 = memref.load %arg2[%c0_88, %c5_89] : memref<8x8xf32, #tpu.memory_space<smem>>
    %209 = vector.broadcast %208 : f32 to vector<1x512xf32>
    %210 = arith.mulf %1, %209 : vector<1x512xf32>
    %c1_90 = arith.constant 1 : index
    %c5_91 = arith.constant 5 : index
    %211 = memref.load %arg2[%c1_90, %c5_91] : memref<8x8xf32, #tpu.memory_space<smem>>
    %212 = vector.broadcast %211 : f32 to vector<1x512xf32>
    %213 = arith.mulf %2, %212 : vector<1x512xf32>
    %214 = arith.addf %210, %213 : vector<1x512xf32>
    %c2_92 = arith.constant 2 : index
    %c5_93 = arith.constant 5 : index
    %215 = memref.load %arg2[%c2_92, %c5_93] : memref<8x8xf32, #tpu.memory_space<smem>>
    %216 = vector.broadcast %215 : f32 to vector<1x512xf32>
    %217 = arith.mulf %3, %216 : vector<1x512xf32>
    %218 = arith.addf %214, %217 : vector<1x512xf32>
    %c3_94 = arith.constant 3 : index
    %c5_95 = arith.constant 5 : index
    %219 = memref.load %arg2[%c3_94, %c5_95] : memref<8x8xf32, #tpu.memory_space<smem>>
    %220 = vector.broadcast %219 : f32 to vector<1x512xf32>
    %221 = arith.mulf %4, %220 : vector<1x512xf32>
    %222 = arith.addf %218, %221 : vector<1x512xf32>
    %c4_96 = arith.constant 4 : index
    %c5_97 = arith.constant 5 : index
    %223 = memref.load %arg2[%c4_96, %c5_97] : memref<8x8xf32, #tpu.memory_space<smem>>
    %224 = vector.broadcast %223 : f32 to vector<1x512xf32>
    %225 = arith.mulf %5, %224 : vector<1x512xf32>
    %226 = arith.addf %222, %225 : vector<1x512xf32>
    %c5_98 = arith.constant 5 : index
    %c5_99 = arith.constant 5 : index
    %227 = memref.load %arg2[%c5_98, %c5_99] : memref<8x8xf32, #tpu.memory_space<smem>>
    %228 = vector.broadcast %227 : f32 to vector<1x512xf32>
    %229 = arith.mulf %6, %228 : vector<1x512xf32>
    %230 = arith.addf %226, %229 : vector<1x512xf32>
    %c6_100 = arith.constant 6 : index
    %c5_101 = arith.constant 5 : index
    %231 = memref.load %arg2[%c6_100, %c5_101] : memref<8x8xf32, #tpu.memory_space<smem>>
    %232 = vector.broadcast %231 : f32 to vector<1x512xf32>
    %233 = arith.mulf %7, %232 : vector<1x512xf32>
    %234 = arith.addf %230, %233 : vector<1x512xf32>
    %c7_102 = arith.constant 7 : index
    %c5_103 = arith.constant 5 : index
    %235 = memref.load %arg2[%c7_102, %c5_103] : memref<8x8xf32, #tpu.memory_space<smem>>
    %236 = vector.broadcast %235 : f32 to vector<1x512xf32>
    %237 = arith.mulf %8, %236 : vector<1x512xf32>
    %238 = arith.addf %234, %237 : vector<1x512xf32>
    %c5_104 = arith.constant 5 : index
    %239 = memref.load %arg3[%c5_104] : memref<8xf32, #tpu.memory_space<smem>>
    %240 = vector.broadcast %239 : f32 to vector<1x512xf32>
    %241 = arith.addf %238, %240 : vector<1x512xf32>
    %cst_105 = arith.constant 0.000000e+00 : f32
    %242 = vector.broadcast %cst_105 : f32 to vector<1x512xf32>
    %243 = arith.maximumf %241, %242 : vector<1x512xf32>
    %c5_106 = arith.constant 5 : index
    %244 = memref.load %arg4[%c5_106] : memref<8xf32, #tpu.memory_space<smem>>
    %245 = vector.broadcast %244 : f32 to vector<1x512xf32>
    %246 = arith.mulf %243, %245 : vector<1x512xf32>
    %247 = arith.addf %207, %246 : vector<1x512xf32>
    %c0_107 = arith.constant 0 : index
    %c6_108 = arith.constant 6 : index
    %248 = memref.load %arg2[%c0_107, %c6_108] : memref<8x8xf32, #tpu.memory_space<smem>>
    %249 = vector.broadcast %248 : f32 to vector<1x512xf32>
    %250 = arith.mulf %1, %249 : vector<1x512xf32>
    %c1_109 = arith.constant 1 : index
    %c6_110 = arith.constant 6 : index
    %251 = memref.load %arg2[%c1_109, %c6_110] : memref<8x8xf32, #tpu.memory_space<smem>>
    %252 = vector.broadcast %251 : f32 to vector<1x512xf32>
    %253 = arith.mulf %2, %252 : vector<1x512xf32>
    %254 = arith.addf %250, %253 : vector<1x512xf32>
    %c2_111 = arith.constant 2 : index
    %c6_112 = arith.constant 6 : index
    %255 = memref.load %arg2[%c2_111, %c6_112] : memref<8x8xf32, #tpu.memory_space<smem>>
    %256 = vector.broadcast %255 : f32 to vector<1x512xf32>
    %257 = arith.mulf %3, %256 : vector<1x512xf32>
    %258 = arith.addf %254, %257 : vector<1x512xf32>
    %c3_113 = arith.constant 3 : index
    %c6_114 = arith.constant 6 : index
    %259 = memref.load %arg2[%c3_113, %c6_114] : memref<8x8xf32, #tpu.memory_space<smem>>
    %260 = vector.broadcast %259 : f32 to vector<1x512xf32>
    %261 = arith.mulf %4, %260 : vector<1x512xf32>
    %262 = arith.addf %258, %261 : vector<1x512xf32>
    %c4_115 = arith.constant 4 : index
    %c6_116 = arith.constant 6 : index
    %263 = memref.load %arg2[%c4_115, %c6_116] : memref<8x8xf32, #tpu.memory_space<smem>>
    %264 = vector.broadcast %263 : f32 to vector<1x512xf32>
    %265 = arith.mulf %5, %264 : vector<1x512xf32>
    %266 = arith.addf %262, %265 : vector<1x512xf32>
    %c5_117 = arith.constant 5 : index
    %c6_118 = arith.constant 6 : index
    %267 = memref.load %arg2[%c5_117, %c6_118] : memref<8x8xf32, #tpu.memory_space<smem>>
    %268 = vector.broadcast %267 : f32 to vector<1x512xf32>
    %269 = arith.mulf %6, %268 : vector<1x512xf32>
    %270 = arith.addf %266, %269 : vector<1x512xf32>
    %c6_119 = arith.constant 6 : index
    %c6_120 = arith.constant 6 : index
    %271 = memref.load %arg2[%c6_119, %c6_120] : memref<8x8xf32, #tpu.memory_space<smem>>
    %272 = vector.broadcast %271 : f32 to vector<1x512xf32>
    %273 = arith.mulf %7, %272 : vector<1x512xf32>
    %274 = arith.addf %270, %273 : vector<1x512xf32>
    %c7_121 = arith.constant 7 : index
    %c6_122 = arith.constant 6 : index
    %275 = memref.load %arg2[%c7_121, %c6_122] : memref<8x8xf32, #tpu.memory_space<smem>>
    %276 = vector.broadcast %275 : f32 to vector<1x512xf32>
    %277 = arith.mulf %8, %276 : vector<1x512xf32>
    %278 = arith.addf %274, %277 : vector<1x512xf32>
    %c6_123 = arith.constant 6 : index
    %279 = memref.load %arg3[%c6_123] : memref<8xf32, #tpu.memory_space<smem>>
    %280 = vector.broadcast %279 : f32 to vector<1x512xf32>
    %281 = arith.addf %278, %280 : vector<1x512xf32>
    %cst_124 = arith.constant 0.000000e+00 : f32
    %282 = vector.broadcast %cst_124 : f32 to vector<1x512xf32>
    %283 = arith.maximumf %281, %282 : vector<1x512xf32>
    %c6_125 = arith.constant 6 : index
    %284 = memref.load %arg4[%c6_125] : memref<8xf32, #tpu.memory_space<smem>>
    %285 = vector.broadcast %284 : f32 to vector<1x512xf32>
    %286 = arith.mulf %283, %285 : vector<1x512xf32>
    %287 = arith.addf %247, %286 : vector<1x512xf32>
    %c0_126 = arith.constant 0 : index
    %c7_127 = arith.constant 7 : index
    %288 = memref.load %arg2[%c0_126, %c7_127] : memref<8x8xf32, #tpu.memory_space<smem>>
    %289 = vector.broadcast %288 : f32 to vector<1x512xf32>
    %290 = arith.mulf %1, %289 : vector<1x512xf32>
    %c1_128 = arith.constant 1 : index
    %c7_129 = arith.constant 7 : index
    %291 = memref.load %arg2[%c1_128, %c7_129] : memref<8x8xf32, #tpu.memory_space<smem>>
    %292 = vector.broadcast %291 : f32 to vector<1x512xf32>
    %293 = arith.mulf %2, %292 : vector<1x512xf32>
    %294 = arith.addf %290, %293 : vector<1x512xf32>
    %c2_130 = arith.constant 2 : index
    %c7_131 = arith.constant 7 : index
    %295 = memref.load %arg2[%c2_130, %c7_131] : memref<8x8xf32, #tpu.memory_space<smem>>
    %296 = vector.broadcast %295 : f32 to vector<1x512xf32>
    %297 = arith.mulf %3, %296 : vector<1x512xf32>
    %298 = arith.addf %294, %297 : vector<1x512xf32>
    %c3_132 = arith.constant 3 : index
    %c7_133 = arith.constant 7 : index
    %299 = memref.load %arg2[%c3_132, %c7_133] : memref<8x8xf32, #tpu.memory_space<smem>>
    %300 = vector.broadcast %299 : f32 to vector<1x512xf32>
    %301 = arith.mulf %4, %300 : vector<1x512xf32>
    %302 = arith.addf %298, %301 : vector<1x512xf32>
    %c4_134 = arith.constant 4 : index
    %c7_135 = arith.constant 7 : index
    %303 = memref.load %arg2[%c4_134, %c7_135] : memref<8x8xf32, #tpu.memory_space<smem>>
    %304 = vector.broadcast %303 : f32 to vector<1x512xf32>
    %305 = arith.mulf %5, %304 : vector<1x512xf32>
    %306 = arith.addf %302, %305 : vector<1x512xf32>
    %c5_136 = arith.constant 5 : index
    %c7_137 = arith.constant 7 : index
    %307 = memref.load %arg2[%c5_136, %c7_137] : memref<8x8xf32, #tpu.memory_space<smem>>
    %308 = vector.broadcast %307 : f32 to vector<1x512xf32>
    %309 = arith.mulf %6, %308 : vector<1x512xf32>
    %310 = arith.addf %306, %309 : vector<1x512xf32>
    %c6_138 = arith.constant 6 : index
    %c7_139 = arith.constant 7 : index
    %311 = memref.load %arg2[%c6_138, %c7_139] : memref<8x8xf32, #tpu.memory_space<smem>>
    %312 = vector.broadcast %311 : f32 to vector<1x512xf32>
    %313 = arith.mulf %7, %312 : vector<1x512xf32>
    %314 = arith.addf %310, %313 : vector<1x512xf32>
    %c7_140 = arith.constant 7 : index
    %c7_141 = arith.constant 7 : index
    %315 = memref.load %arg2[%c7_140, %c7_141] : memref<8x8xf32, #tpu.memory_space<smem>>
    %316 = vector.broadcast %315 : f32 to vector<1x512xf32>
    %317 = arith.mulf %8, %316 : vector<1x512xf32>
    %318 = arith.addf %314, %317 : vector<1x512xf32>
    %c7_142 = arith.constant 7 : index
    %319 = memref.load %arg3[%c7_142] : memref<8xf32, #tpu.memory_space<smem>>
    %320 = vector.broadcast %319 : f32 to vector<1x512xf32>
    %321 = arith.addf %318, %320 : vector<1x512xf32>
    %cst_143 = arith.constant 0.000000e+00 : f32
    %322 = vector.broadcast %cst_143 : f32 to vector<1x512xf32>
    %323 = arith.maximumf %321, %322 : vector<1x512xf32>
    %c7_144 = arith.constant 7 : index
    %324 = memref.load %arg4[%c7_144] : memref<8xf32, #tpu.memory_space<smem>>
    %325 = vector.broadcast %324 : f32 to vector<1x512xf32>
    %326 = arith.mulf %323, %325 : vector<1x512xf32>
    %327 = arith.addf %287, %326 : vector<1x512xf32>
    %c0_145 = arith.constant 0 : index
    %328 = memref.load %arg5[%c0_145] : memref<1xf32, #tpu.memory_space<smem>>
    %329 = vector.broadcast %328 : f32 to vector<1x512xf32>
    %330 = arith.addf %327, %329 : vector<1x512xf32>
    %c0_146 = arith.constant 0 : index
    %c0_147 = arith.constant 0 : index
    %331 = vector.load %arg6[%c0_146, %c0_147] : memref<1x512xf32, #tpu.memory_space<vmem>>, vector<1x512xf32>
    tpu.vector_store %arg6[%c0_146, %c0_147], %330 {strides = array<i32>} : memref<1x512xf32, #tpu.memory_space<vmem>>, vector<1x512xf32>,
    return
  }
  func.func @transform_0(%arg0: i32) -> (i32, i32) {
    %c0_i32 = arith.constant 0 : i32
    %c0_i32_0 = arith.constant 0 : i32
    return %c0_i32, %arg0 : i32, i32
  }
  func.func @transform_1(%arg0: i32) -> (i32, i32) {
    %c0_i32 = arith.constant 0 : i32
    %c0_i32_0 = arith.constant 0 : i32
    %c0_i32_1 = arith.constant 0 : i32
    return %c0_i32, %c0_i32_0 : i32, i32
  }
  func.func @transform_2(%arg0: i32) -> i32 {
    %c0_i32 = arith.constant 0 : i32
    %c0_i32_0 = arith.constant 0 : i32
    return %c0_i32 : i32
  }
  func.func @transform_3(%arg0: i32) -> i32 {
    %c0_i32 = arith.constant 0 : i32
    %c0_i32_0 = arith.constant 0 : i32
    return %c0_i32 : i32
  }
  func.func @transform_4(%arg0: i32) -> i32 {
    %c0_i32 = arith.constant 0 : i32
    %c0_i32_0 = arith.constant 0 : i32
    return %c0_i32 : i32
  }
  func.func @transform_5(%arg0: i32) -> (i32, i32) {
    %c0_i32 = arith.constant 0 : i32
    %c0_i32_0 = arith.constant 0 : i32
    return %c0_i32, %arg0 : i32, i32
  }
}

</mosaic_0001>

<bundles_post_ra>
// kernel: tpu_custom_call.1
= control target key start
LH: loop header
LB: loop body
LE: loop exit
PB: predicated region body
PF: predicated region fallthrough
CT: control target
= control target key end

     0   :  { %11 = vsyncpa [#allocation4], 0  ;;  %s2501_s0 = inlined_call_operand.hbm [shape: f32[8,512], index: 0, kind: input, shape index: {}]   ;;  %s2502_s1 = inlined_call_operand.hbm [shape: f32[8,8], index: 1, kind: input, shape index: {}]   ;;  %s2503_s2 = inlined_call_operand.vmem [shape: f32[8], index: 2, kind: input, shape index: {}]   ;;  %s2504_s3 = inlined_call_operand.vmem [shape: f32[8], index: 3, kind: input, shape index: {}]   ;;  %s2505_s4 = inlined_call_operand.<no memory space> [shape: f32[1], index: 4, kind: input, shape index: {}]   ;;  %s2506_s5 = inlined_call_operand.hbm [shape: f32[1,512], index: 5, kind: output, shape index: {}]  }
   0x1   :  { %12 = vsyncpa [#allocation6], 0 }
   0x2   :  { %13 = vsyncpa [#allocation7], 0 }
   0x3   :  { %14 = vsyncpa [#allocation11], 0 }
   0x4   :  { %15 = vsyncpa [#allocation5], 0  ;;  %s1736_s18 = smov [#allocation3]   ;;  %s40_s22 = sshll.u32 %s2503_s2, 4  ;;  %s41_s22 = int_to_ptr.vmem [resolvable:$true] %s40_s22 }
   0x5   :  { %s22_s19 = sshll.u32 %s1736_s18, 4  ;;  %s23_s19 = int_to_ptr.vmem [resolvable:$true] %s22_s19 }
   0x6   :  { %s1662_s23 = scalar_lea.vmem %s23_s19, 512  ;;  %p1667_p1 = scmp.lt.s32.totalorder %s23_s19, %s23_s19 }
   0x7   :  { %p1663_p0 = scmp.ne.s32.totalorder %s23_s19, %s1662_s23  ;;  %p1668_p2 = scmp.lt.s32.totalorder %s1662_s23, %s1662_s23 }
   0x9   :  { %p1669_p3 = por %p1668_p2, %p1667_p1 }
   0xb   :  { %p1670_p4 = pnand %p1669_p3, %p1663_p0 }
   0xd   :  { %1673 = shalt.err (!%p1670_p4)
}
   0xe   :  { %25 = dma.hbm_to_vmem [thread:$0]  %s2501_s0, 512, %s23_s19, [#allocation4]  }
   0xf   :  { %s1737_s26 = smov [#allocation8]   ;;  %s50_s30 = sshll.u32 %s2504_s3, 4  ;;  %s51_s30 = int_to_ptr.vmem [resolvable:$true] %s50_s30 }
  0x10   :  { %33 = dma.hbm_to_smem %s2502_s1, 128, %s1737_s26, [#allocation6]  }
  0x11   :  { %s1682_s6 = scalar_lea.vmem %s41_s22, 16  ;;  %p1687_p6 = scmp.lt.s32.totalorder %s41_s22, %s41_s22 }
  0x12   :  { %p1683_p5 = scmp.ne.s32.totalorder %s41_s22, %s1682_s6  ;;  %p1688_p7 = scmp.lt.s32.totalorder %s1682_s6, %s1682_s6 }
  0x14   :  { %p1689_p8 = por %p1688_p7, %p1687_p6 }
  0x16   :  { %p1690_p9 = pnand %p1689_p8, %p1683_p5 }
  0x18   :  { %1693 = shalt.err (!%p1690_p9)
}
  0x19   :  { %s1738_s7 = smov [#allocation9]   ;;  %s1694_s0 = scalar_lea.vmem %s51_s30, 16 }
  0x1a   :  { %43 = dma.vmem_to_smem %s41_s22, 16, %s1738_s7, [#allocation7]  }
  0x1b   :  { %p1695_p10 = scmp.ne.s32.totalorder %s51_s30, %s1694_s0  ;;  %p1699_p11 = scmp.lt.s32.totalorder %s51_s30, %s51_s30 }
  0x1c   :  { %p1700_p12 = scmp.lt.s32.totalorder %s1694_s0, %s1694_s0 }
  0x1e   :  { %p1701_p13 = por %p1700_p12, %p1699_p11 }
  0x20   :  { %p1702_p0 = pnand %p1701_p13, %p1695_p10 }
  0x22   :  { %1705 = shalt.err (!%p1702_p0)
}
  0x23   :  { %s1739_s1 = smov [#allocation10]  }
  0x24   :  { %53 = dma.vmem_to_smem %s51_s30, 16, %s1739_s1, [#allocation11]  }
  0x25   :  { %1726 = dma.done.wait [#allocation4], 512  }
  0x26   :  { %1727 = vsyncadd [#allocation4], 4294966784 }
  0x27   :  { %1728 = dma.done.wait [#allocation6], 128  }
  0x28   :  { %1729 = vsyncadd [#allocation6], 4294967168 }
  0x29   :  { %1730 = dma.done.wait [#allocation7], 16  }
  0x2a   :  { %1731 = vsyncadd [#allocation7], 4294967280 }
  0x2b   :  { %1732 = dma.done.wait [#allocation11], 16  }
  0x2c   :  { %1733 = vsyncadd [#allocation11], 4294967280 }
  0x2d   :  { %68 = sfence }
  0x2e   :  { %s73_s3 = sld [smem:[#allocation8]]  ;;  %v1788_v0 = vld [vmem:[#allocation3] sm:$0xff]  ;;  %v1792_v1 = vld [vmem:[#allocation3 + $0x8] sm:$0xff]  ;;  %v1794_v2 = vld [vmem:[#allocation3 + $0x10] sm:$0xff] }
  0x2f   :  { %s1567_s8 = sld [smem:[#allocation8 + $0x80]]  ;;  %v1796_v3 = vld [vmem:[#allocation3 + $0x18] sm:$0xff] }
  0x30   :  { %s1568_s9 = sld [smem:[#allocation8 + $0x100]] }
  0x31   :  { %s1784_s10 = sld [smem:[#allocation8 + $0x180]] }
  0x32   :  { %s1786_s11 = sld [smem:[#allocation8 + $0x200]] }
  0x33   :  { %s1790_s12 = sld [smem:[#allocation8 + $0x280]] }
  0x34   :  { %v74_v4 = vstv %s73_s3  ;;  %s1798_s13 = sld [smem:[#allocation8 + $0x300]] }
  0x35   :  { %v75_v5 = vmul.f32 %v74_v4, %v1788_v0  ;;  %v76_v6 = vmul.f32 %v74_v4, %v1792_v1  ;;  %v77_v7 = vmul.f32 %v74_v4, %v1794_v2  ;;  %v78_v8 = vmul.f32 %v74_v4, %v1796_v3  ;;  %s1824_s14 = sld [smem:[#allocation8 + $0x380]] }
  0x36   :  { %v80_v9 = vstv %s1567_s8  ;;  %v102_v10 = vstv %s1568_s9  ;;  %s1826_s15 = sld [smem:[#allocation8 + $0x1]] }
  0x37   :  { %v81_v11 = vmul.f32 %v80_v9, %v1788_v0  ;;  %v82_v12 = vmul.f32 %v80_v9, %v1792_v1  ;;  %v83_v13 = vmul.f32 %v80_v9, %v1794_v2  ;;  %v84_v14 = vmul.f32 %v80_v9, %v1796_v3  ;;  %s1832_s16 = sld [smem:[#allocation9]] }
  0x38   :  { %v103_v15 = vmul.f32 %v102_v10, %v1788_v0  ;;  %v104_v16 = vmul.f32 %v102_v10, %v1792_v1  ;;  %v105_v17 = vmul.f32 %v102_v10, %v1794_v2  ;;  %v106_v18 = vmul.f32 %v102_v10, %v1796_v3  ;;  %s1575_s17 = sld [smem:[#allocation8 + $0x81]] }
  0x39   :  { %v89_v19 = vrot.slane %v81_v11, 1  ;;  %v90_v20 = vrot.slane %v82_v12, 1  ;;  %v91_v21 = vrot.slane %v83_v13, 1  ;;  %v92_v22 = vrot.slane %v84_v14, 1  ;;  %s1838_s18 = sld [smem:[#allocation10]] }
  0x3a   :  { %v111_v23 = vrot.slane %v103_v15, 2  ;;  %v112_v24 = vrot.slane %v104_v16, 2  ;;  %v113_v25 = vrot.slane %v105_v17, 2  ;;  %v114_v26 = vrot.slane %v106_v18, 2  ;;  %s1842_s19 = sld [smem:[#allocation8 + $0x101]] }
  0x3b   :  { %v97_v27 = vadd.f32 %v89_v19, %v75_v5  ;;  %v98_v28 = vadd.f32 %v90_v20, %v76_v6  ;;  %v99_v29 = vadd.f32 %v91_v21, %v77_v7  ;;  %v100_v30 = vadd.f32 %v92_v22, %v78_v8  ;;  %s1844_s20 = sld [smem:[#allocation8 + $0x181]] }
  0x3c   :  { %v124_v31 = vstv %s1784_s10  ;;  %v146_v32 = vstv %s1786_s11  ;;  %v168_v33 = vstv %s1790_s12  ;;  %v190_v34 = vstv %s1798_s13  ;;  %s1578_s21 = sld [smem:[#allocation8 + $0x201]] }
  0x3d   :  { %v119_v35 = vadd.f32 %v111_v23, %v97_v27  ;;  %v120_v36 = vadd.f32 %v112_v24, %v98_v28  ;;  %v121_v37 = vadd.f32 %v113_v25, %v99_v29  ;;  %v122_v38 = vadd.f32 %v114_v26, %v100_v30  ;;  %s1874_s22 = sld [smem:[#allocation8 + $0x281]] }
  0x3e   :  { %v125_v39 = vmul.f32 %v124_v31, %v1788_v0  ;;  %v126_v40 = vmul.f32 %v124_v31, %v1792_v1  ;;  %v127_v41 = vmul.f32 %v124_v31, %v1794_v2  ;;  %v128_v42 = vmul.f32 %v124_v31, %v1796_v3  ;;  %s1876_s23 = sld [smem:[#allocation8 + $0x301]] }
  0x3f   :  { %v147_v43 = vmul.f32 %v146_v32, %v1788_v0  ;;  %v148_v44 = vmul.f32 %v146_v32, %v1792_v1  ;;  %v149_v45 = vmul.f32 %v146_v32, %v1794_v2  ;;  %v150_v46 = vmul.f32 %v146_v32, %v1796_v3  ;;  %s1882_s24 = sld [smem:[#allocation8 + $0x381]] }
  0x40   :  { %v133_v47 = vrot.slane %v125_v39, 3  ;;  %v134_v48 = vrot.slane %v126_v40, 3  ;;  %v135_v49 = vrot.slane %v127_v41, 3  ;;  %v136_v50 = vrot.slane %v128_v42, 3  ;;  %s1896_s25 = sld [smem:[#allocation9 + $0x1]] }
  0x41   :  { %v155_v51 = vrot.slane %v147_v43, 4  ;;  %v156_v52 = vrot.slane %v148_v44, 4  ;;  %v157_v53 = vrot.slane %v149_v45, 4  ;;  %v158_v54 = vrot.slane %v150_v46, 4  ;;  %s1898_s26 = sld [smem:[#allocation8 + $0x2]] }
  0x42   :  { %v141_v55 = vadd.f32 %v133_v47, %v119_v35  ;;  %v142_v56 = vadd.f32 %v134_v48, %v120_v36  ;;  %v143_v57 = vadd.f32 %v135_v49, %v121_v37  ;;  %v144_v58 = vadd.f32 %v136_v50, %v122_v38  ;;  %s1904_s27 = sld [smem:[#allocation8 + $0x82]] }
  0x43   :  { %v169_v59 = vmul.f32 %v168_v33, %v1788_v0  ;;  %v170_v60 = vmul.f32 %v168_v33, %v1792_v1  ;;  %v171_v61 = vmul.f32 %v168_v33, %v1794_v2  ;;  %v172_v62 = vmul.f32 %v168_v33, %v1796_v3  ;;  %s1910_s28 = sld [smem:[#allocation10 + $0x1]] }
  0x44   :  { %v163_v63 = vadd.f32 %v155_v51, %v141_v55  ;;  %v164_v4 = vadd.f32 %v156_v52, %v142_v56  ;;  %v165_v5 = vadd.f32 %v157_v53, %v143_v57  ;;  %v166_v6 = vadd.f32 %v158_v54, %v144_v58  ;;  %s1916_s29 = sld [smem:[#allocation8 + $0x102]] }
  0x45   :  { %v177_v7 = vrot.slane %v169_v59, 5  ;;  %v178_v8 = vrot.slane %v170_v60, 5  ;;  %v179_v9 = vrot.slane %v171_v61, 5  ;;  %v180_v10 = vrot.slane %v172_v62, 5  ;;  %s1922_s2 = sld [smem:[#allocation8 + $0x182]] }
  0x46   :  { %v191_v11 = vmul.f32 %v190_v34, %v1788_v0  ;;  %v192_v12 = vmul.f32 %v190_v34, %v1792_v1  ;;  %v193_v13 = vmul.f32 %v190_v34, %v1794_v2  ;;  %v194_v14 = vmul.f32 %v190_v34, %v1796_v3  ;;  %s1924_s30 = sld [smem:[#allocation8 + $0x202]] }
  0x47   :  { %v185_v15 = vadd.f32 %v177_v7, %v163_v63  ;;  %v186_v16 = vadd.f32 %v178_v8, %v164_v4  ;;  %v187_v17 = vadd.f32 %v179_v9, %v165_v5  ;;  %v188_v18 = vadd.f32 %v180_v10, %v166_v6  ;;  %s1932_s6 = sld [smem:[#allocation8 + $0x282]] }
  0x48   :  { %v199_v19 = vrot.slane %v191_v11, 6  ;;  %v200_v20 = vrot.slane %v192_v12, 6  ;;  %v201_v21 = vrot.slane %v193_v13, 6  ;;  %v202_v22 = vrot.slane %v194_v14, 6  ;;  %s1936_s7 = sld [smem:[#allocation8 + $0x302]] }
  0x49   :  { %v212_v23 = vstv %s1824_s14  ;;  %v250_v24 = vstv %s1826_s15  ;;  %v234_v37 = vstv %s1832_s16  ;;  %v256_v40 = vstv %s1575_s17  ;;  %s1985_s0 = sld [smem:[#allocation8 + $0x382]] }
  0x4a   :  { %v207_v25 = vadd.f32 %v199_v19, %v185_v15  ;;  %v208_v26 = vadd.f32 %v200_v20, %v186_v16  ;;  %v209_v27 = vadd.f32 %v201_v21, %v187_v17  ;;  %v210_v28 = vadd.f32 %v202_v22, %v188_v18  ;;  %s1987_s1 = sld [smem:[#allocation8 + $0x3]] }
  0x4b   :  { %v213_v29 = vmul.f32 %v212_v23, %v1788_v0  ;;  %v214_v30 = vmul.f32 %v212_v23, %v1792_v1  ;;  %v215_v31 = vmul.f32 %v212_v23, %v1794_v2  ;;  %v216_v32 = vmul.f32 %v212_v23, %v1796_v3  ;;  %s1993_s3 = sld [smem:[#allocation9 + $0x2]] }
  0x4c   :  { %v251_v38 = vmul.f32 %v250_v24, %v1788_v0  ;;  %v252_v39 = vmul.f32 %v250_v24, %v1792_v1  ;;  %v257_v45 = vmul.f32 %v256_v40, %v1788_v0  ;;  %v258_v46 = vmul.f32 %v256_v40, %v1792_v1  ;;  %s1999_s8 = sld [smem:[#allocation8 + $0x83]] }
  0x4d   :  { %v221_v33 = vrot.slane %v213_v29, 7  ;;  %v222_v34 = vrot.slane %v214_v30, 7  ;;  %v223_v35 = vrot.slane %v215_v31, 7  ;;  %v224_v36 = vrot.slane %v216_v32, 7  ;;  %s2009_s9 = sld [smem:[#allocation8 + $0x103]] }
  0x4e   :  { %v259_v47 = vmul.f32 %v256_v40, %v1794_v2  ;;  %v260_v48 = vmul.f32 %v256_v40, %v1796_v3  ;;  %v253_v51 = vmul.f32 %v250_v24, %v1794_v2  ;;  %v254_v52 = vmul.f32 %v250_v24, %v1796_v3  ;;  %s2011_s10 = sld [smem:[#allocation10 + $0x2]] }
  0x4f   :  { %v229_v41 = vadd.f32 %v221_v33, %v207_v25  ;;  %v230_v42 = vadd.f32 %v222_v34, %v208_v26  ;;  %v231_v43 = vadd.f32 %v223_v35, %v209_v27  ;;  %v232_v44 = vadd.f32 %v224_v36, %v210_v28  ;;  %s2017_s11 = sld [smem:[#allocation8 + $0x183]] }
  0x50   :  { %v265_v53 = vrot.slane %v257_v45, 1  ;;  %v266_v54 = vrot.slane %v258_v46, 1  ;;  %v267_v55 = vrot.slane %v259_v47, 1  ;;  %v268_v56 = vrot.slane %v260_v48, 1  ;;  %s2032_s12 = sld [smem:[#allocation8 + $0x203]] }
  0x51   :  { %v1857_v49 = vadd.f32 %v234_v37, %v229_v41  ;;  %v1859_v50 = vadd.f32 %v234_v37, %v230_v42  ;;  %v1864_v57 = vstv %s1838_s18  ;;  %v278_v58 = vstv %s1842_s19  ;;  %s2053_s13 = sld [smem:[#allocation8 + $0x283]] }
  0x52   :  { %v300_v59 = vstv %s1844_s20  ;;  %v322_v60 = vstv %s1578_s21  ;;  %v1868_v61 = vadd.f32 %v234_v37, %v231_v43  ;;  %v1870_v62 = vadd.f32 %v234_v37, %v232_v44  ;;  %s2059_s14 = sld [smem:[#allocation8 + $0x303]] }
  0x53   :  { %v239_v63 = vmax.f32 %v1857_v49, 0.0  ;;  %v240_v4 = vmax.f32 %v1859_v50, 0.0  ;;  %v273_v5 = vadd.f32 %v265_v53, %v251_v38  ;;  %v274_v6 = vadd.f32 %v266_v54, %v252_v39  ;;  %s2068_s15 = sld [smem:[#allocation8 + $0x383]] }
  0x54   :  { %v275_v7 = vadd.f32 %v267_v55, %v253_v51  ;;  %v276_v8 = vadd.f32 %v268_v56, %v254_v52  ;;  %v279_v9 = vmul.f32 %v278_v58, %v1788_v0  ;;  %v280_v10 = vmul.f32 %v278_v58, %v1792_v1  ;;  %s2084_s16 = sld [smem:[#allocation9 + $0x3]] }
  0x55   :  { %v281_v11 = vmul.f32 %v278_v58, %v1794_v2  ;;  %v282_v12 = vmul.f32 %v278_v58, %v1796_v3  ;;  %v301_v13 = vmul.f32 %v300_v59, %v1788_v0  ;;  %v302_v14 = vmul.f32 %v300_v59, %v1792_v1  ;;  %s2086_s17 = sld [smem:[#allocation8 + $0x4]] }
  0x56   :  { %v303_v15 = vmul.f32 %v300_v59, %v1794_v2  ;;  %v304_v16 = vmul.f32 %v300_v59, %v1796_v3  ;;  %v287_v17 = vrot.slane %v279_v9, 2  ;;  %v288_v18 = vrot.slane %v280_v10, 2  ;;  %s2092_s18 = sld [smem:[#allocation8 + $0x84]] }
  0x57   :  { %v289_v19 = vrot.slane %v281_v11, 2  ;;  %v290_v20 = vrot.slane %v282_v12, 2  ;;  %v309_v21 = vrot.slane %v301_v13, 3  ;;  %v310_v22 = vrot.slane %v302_v14, 3  ;;  %s2098_s19 = sld [smem:[#allocation10 + $0x3]] }
  0x58   :  { %v311_v23 = vrot.slane %v303_v15, 3  ;;  %v312_v24 = vrot.slane %v304_v16, 3  ;;  %v295_v25 = vadd.f32 %v287_v17, %v273_v5  ;;  %v296_v26 = vadd.f32 %v288_v18, %v274_v6  ;;  %s2104_s20 = sld [smem:[#allocation8 + $0x104]] }
  0x59   :  { %v297_v27 = vadd.f32 %v289_v19, %v275_v7  ;;  %v298_v28 = vadd.f32 %v290_v20, %v276_v8  ;;  %v323_v29 = vmul.f32 %v322_v60, %v1788_v0  ;;  %v324_v30 = vmul.f32 %v322_v60, %v1792_v1  ;;  %s2114_s21 = sld [smem:[#allocation8 + $0x184]] }
  0x5a   :  { %v325_v31 = vmul.f32 %v322_v60, %v1794_v2  ;;  %v326_v32 = vmul.f32 %v322_v60, %v1796_v3  ;;  %v317_v33 = vadd.f32 %v309_v21, %v295_v25  ;;  %v318_v34 = vadd.f32 %v310_v22, %v296_v26 }
  0x5b   :  { %v319_v35 = vadd.f32 %v311_v23, %v297_v27  ;;  %v320_v36 = vadd.f32 %v312_v24, %v298_v28  ;;  %v331_v37 = vrot.slane %v323_v29, 4  ;;  %v332_v38 = vrot.slane %v324_v30, 4 }
  0x5c   :  { %v333_v39 = vrot.slane %v325_v31, 4  ;;  %v334_v40 = vrot.slane %v326_v32, 4  ;;  %v241_v41 = vmax.f32 %v1868_v61, 0.0  ;;  %v344_v42 = vstv %s1874_s22  ;;  %s2116_s22 = sld [smem:[#allocation8 + $0x204]] }
  0x5d   :  { %v366_v43 = vstv %s1876_s23  ;;  %v388_v44 = vstv %s1882_s24  ;;  %v339_v45 = vadd.f32 %v331_v37, %v317_v33  ;;  %v340_v46 = vadd.f32 %v332_v38, %v318_v34  ;;  %s2124_s23 = sld [smem:[#allocation8 + $0x284]] }
  0x5e   :  { %v341_v47 = vadd.f32 %v333_v39, %v319_v35  ;;  %v342_v48 = vadd.f32 %v334_v40, %v320_v36  ;;  %v345_v51 = vmul.f32 %v344_v42, %v1788_v0  ;;  %v346_v52 = vmul.f32 %v344_v42, %v1792_v1  ;;  %s2128_s24 = sld [smem:[#allocation8 + $0x304]] }
  0x5f   :  { %v347_v53 = vmul.f32 %v344_v42, %v1794_v2  ;;  %v348_v54 = vmul.f32 %v344_v42, %v1796_v3  ;;  %v367_v55 = vmul.f32 %v366_v43, %v1788_v0  ;;  %v368_v56 = vmul.f32 %v366_v43, %v1792_v1 }
  0x60   :  { %v369_v58 = vmul.f32 %v366_v43, %v1794_v2  ;;  %v370_v59 = vmul.f32 %v366_v43, %v1796_v3  ;;  %v353_v60 = vrot.slane %v345_v51, 5  ;;  %v354_v5 = vrot.slane %v346_v52, 5 }
  0x61   :  { %v355_v6 = vrot.slane %v347_v53, 5  ;;  %v356_v7 = vrot.slane %v348_v54, 5  ;;  %v375_v8 = vrot.slane %v367_v55, 6  ;;  %v376_v9 = vrot.slane %v368_v56, 6 }
  0x62   :  { %v377_v10 = vrot.slane %v369_v58, 6  ;;  %v378_v11 = vrot.slane %v370_v59, 6  ;;  %v361_v12 = vadd.f32 %v353_v60, %v339_v45  ;;  %v362_v13 = vadd.f32 %v354_v5, %v340_v46 }
  0x63   :  { %v363_v14 = vadd.f32 %v355_v6, %v341_v47  ;;  %v364_v15 = vadd.f32 %v356_v7, %v342_v48  ;;  %v389_v16 = vmul.f32 %v388_v44, %v1788_v0  ;;  %v390_v17 = vmul.f32 %v388_v44, %v1792_v1 }
  0x64   :  { %v391_v18 = vmul.f32 %v388_v44, %v1794_v2  ;;  %v392_v19 = vmul.f32 %v388_v44, %v1796_v3  ;;  %v383_v20 = vadd.f32 %v375_v8, %v361_v12  ;;  %v384_v21 = vadd.f32 %v376_v9, %v362_v13 }
  0x65   :  { %v385_v22 = vadd.f32 %v377_v10, %v363_v14  ;;  %v386_v23 = vadd.f32 %v378_v11, %v364_v15  ;;  %v397_v24 = vrot.slane %v389_v16, 7  ;;  %v398_v25 = vrot.slane %v390_v17, 7 }
  0x66   :  { %v399_v26 = vrot.slane %v391_v18, 7  ;;  %v400_v27 = vrot.slane %v392_v19, 7  ;;  %v242_v28 = vmax.f32 %v1870_v62, 0.0  ;;  %v410_v29 = vstv %s1896_s25  ;;  %s2182_s25 = sld [smem:[#allocation8 + $0x384]] }
  0x67   :  { %v430_v30 = vstv %s1898_s26  ;;  %v436_v31 = vstv %s1904_s27  ;;  %v405_v32 = vadd.f32 %v397_v24, %v383_v20  ;;  %v406_v33 = vadd.f32 %v398_v25, %v384_v21  ;;  %s2184_s26 = sld [smem:[#allocation8 + $0x5]] }
  0x68   :  { %v407_v34 = vadd.f32 %v399_v26, %v385_v22  ;;  %v408_v35 = vadd.f32 %v400_v27, %v386_v23  ;;  %v1927_v36 = vstv %s1910_s28  ;;  %v431_v37 = vmul.f32 %v430_v30, %v1788_v0  ;;  %s2190_s27 = sld [smem:[#allocation9 + $0x4]] }
  0x69   :  { %v432_v38 = vmul.f32 %v430_v30, %v1792_v1  ;;  %v433_v39 = vmul.f32 %v430_v30, %v1794_v2  ;;  %v411_v40 = vadd.f32 %v410_v29, %v405_v32  ;;  %v412_v42 = vadd.f32 %v410_v29, %v406_v33  ;;  %s2196_s28 = sld [smem:[#allocation8 + $0x85]] }
  0x6a   :  { %v413_v43 = vadd.f32 %v410_v29, %v407_v34  ;;  %v1934_v44 = vadd.f32 %v410_v29, %v408_v35  ;;  %v437_v45 = vmul.f32 %v436_v31, %v1788_v0  ;;  %v438_v46 = vmul.f32 %v436_v31, %v1792_v1 }
  0x6b   :  { %v439_v47 = vmul.f32 %v436_v31, %v1794_v2  ;;  %v440_v48 = vmul.f32 %v436_v31, %v1796_v3  ;;  %v415_v51 = vmax.f32 %v411_v40, 0.0  ;;  %v416_v52 = vmax.f32 %v412_v42, 0.0 }
  0x6c   :  { %v417_v53 = vmax.f32 %v413_v43, 0.0  ;;  %v434_v54 = vmul.f32 %v430_v30, %v1796_v3  ;;  %v445_v55 = vrot.slane %v437_v45, 1  ;;  %v446_v56 = vrot.slane %v438_v46, 1 }
  0x6d   :  { %v447_v58 = vrot.slane %v439_v47, 1  ;;  %v448_v59 = vrot.slane %v440_v48, 1  ;;  %v1946_v60 = vmul.f32 %v1864_v57, %v239_v63  ;;  %v1951_v5 = vmul.f32 %v1864_v57, %v240_v4 }
  0x6e   :  { %v1956_v6 = vmul.f32 %v1864_v57, %v241_v41  ;;  %v458_v7 = vstv %s1916_s29  ;;  %v418_v49 = vmax.f32 %v1934_v44, 0.0  ;;  %v1961_v63 = vmul.f32 %v1927_v36, %v415_v51  ;;  %s2205_s29 = sld [smem:[#allocation8 + $0x105]] }
  0x6f   :  { %v1964_v50 = vmul.f32 %v1927_v36, %v416_v52  ;;  %v1967_v4 = vmul.f32 %v1927_v36, %v417_v53  ;;  %v453_v8 = vadd.f32 %v445_v55, %v431_v37  ;;  %v454_v61 = vadd.f32 %v446_v56, %v432_v38 }
  0x70   :  { %v455_v9 = vadd.f32 %v447_v58, %v433_v39  ;;  %v456_v10 = vadd.f32 %v448_v59, %v434_v54  ;;  %v459_v41 = vmul.f32 %v458_v7, %v1788_v0  ;;  %v460_v11 = vmul.f32 %v458_v7, %v1792_v1 }
  0x71   :  { %v461_v12 = vmul.f32 %v458_v7, %v1794_v2  ;;  %v462_v13 = vmul.f32 %v458_v7, %v1796_v3  ;;  %v480_v14 = vstv %s1922_s2  ;;  %v502_v15 = vstv %s1924_s30  ;;  %s2207_s2 = sld [smem:[#allocation10 + $0x4]] }
  0x72   :  { %v524_v16 = vstv %s1932_s6  ;;  %v546_v17 = vstv %s1936_s7  ;;  %v467_v18 = vrot.slane %v459_v41, 2  ;;  %v468_v19 = vrot.slane %v460_v11, 2  ;;  %s2213_s30 = sld [smem:[#allocation8 + $0x185]] }
  0x73   :  { %v469_v20 = vrot.slane %v461_v12, 2  ;;  %v470_v21 = vrot.slane %v462_v13, 2  ;;  %v481_v22 = vmul.f32 %v480_v14, %v1788_v0  ;;  %v482_v23 = vmul.f32 %v480_v14, %v1792_v1  ;;  %s2228_s6 = sld [smem:[#allocation8 + $0x205]] }
  0x74   :  { %v483_v24 = vmul.f32 %v480_v14, %v1794_v2  ;;  %v484_v25 = vmul.f32 %v480_v14, %v1796_v3  ;;  %v475_v26 = vadd.f32 %v467_v18, %v453_v8  ;;  %v476_v27 = vadd.f32 %v468_v19, %v454_v61  ;;  %s2249_s7 = sld [smem:[#allocation8 + $0x285]] }
  0x75   :  { %v477_v29 = vadd.f32 %v469_v20, %v455_v9  ;;  %v478_v30 = vadd.f32 %v470_v21, %v456_v10  ;;  %v489_v31 = vrot.slane %v481_v22, 3  ;;  %v490_v32 = vrot.slane %v482_v23, 3 }
  0x76   :  { %v491_v33 = vrot.slane %v483_v24, 3  ;;  %v492_v34 = vrot.slane %v484_v25, 3  ;;  %v503_v35 = vmul.f32 %v502_v15, %v1788_v0  ;;  %v504_v37 = vmul.f32 %v502_v15, %v1792_v1 }
  0x77   :  { %v505_v38 = vmul.f32 %v502_v15, %v1794_v2  ;;  %v506_v39 = vmul.f32 %v502_v15, %v1796_v3  ;;  %v497_v40 = vadd.f32 %v489_v31, %v475_v26  ;;  %v498_v42 = vadd.f32 %v490_v32, %v476_v27 }
  0x78   :  { %v499_v43 = vadd.f32 %v491_v33, %v477_v29  ;;  %v500_v45 = vadd.f32 %v492_v34, %v478_v30  ;;  %v511_v46 = vrot.slane %v503_v35, 4  ;;  %v512_v47 = vrot.slane %v504_v37, 4 }
  0x79   :  { %v513_v48 = vrot.slane %v505_v38, 4  ;;  %v514_v51 = vrot.slane %v506_v39, 4  ;;  %v525_v52 = vmul.f32 %v524_v16, %v1788_v0  ;;  %v526_v53 = vmul.f32 %v524_v16, %v1792_v1 }
  0x7a   :  { %v527_v54 = vmul.f32 %v524_v16, %v1794_v2  ;;  %v528_v55 = vmul.f32 %v524_v16, %v1796_v3  ;;  %v519_v56 = vadd.f32 %v511_v46, %v497_v40  ;;  %v520_v58 = vadd.f32 %v512_v47, %v498_v42 }
  0x7b   :  { %v521_v59 = vadd.f32 %v513_v48, %v499_v43  ;;  %v522_v7 = vadd.f32 %v514_v51, %v500_v45  ;;  %v533_v8 = vrot.slane %v525_v52, 5  ;;  %v534_v61 = vrot.slane %v526_v53, 5 }
  0x7c   :  { %v535_v9 = vrot.slane %v527_v54, 5  ;;  %v536_v10 = vrot.slane %v528_v55, 5  ;;  %v547_v41 = vmul.f32 %v546_v17, %v1788_v0  ;;  %v548_v11 = vmul.f32 %v546_v17, %v1792_v1 }
  0x7d   :  { %v549_v12 = vmul.f32 %v546_v17, %v1794_v2  ;;  %v550_v13 = vmul.f32 %v546_v17, %v1796_v3  ;;  %v541_v14 = vadd.f32 %v533_v8, %v519_v56  ;;  %v542_v15 = vadd.f32 %v534_v61, %v520_v58 }
  0x7e   :  { %v543_v16 = vadd.f32 %v535_v9, %v521_v59  ;;  %v544_v18 = vadd.f32 %v536_v10, %v522_v7  ;;  %v555_v19 = vrot.slane %v547_v41, 6  ;;  %v556_v20 = vrot.slane %v548_v11, 6 }
  0x7f   :  { %v557_v21 = vrot.slane %v549_v12, 6  ;;  %v558_v22 = vrot.slane %v550_v13, 6  ;;  %v248_v23 = vmul.f32 %v1864_v57, %v242_v28  ;;  %v424_v24 = vmul.f32 %v1927_v36, %v418_v49 }
  0x80   :  { %v568_v25 = vstv %s1985_s0  ;;  %v610_v17 = vstv %s1987_s1  ;;  %v563_v26 = vadd.f32 %v555_v19, %v541_v14  ;;  %v564_v27 = vadd.f32 %v556_v20, %v542_v15  ;;  %s2255_s0 = sld [smem:[#allocation8 + $0x305]] }
  0x81   :  { %v565_v29 = vadd.f32 %v557_v21, %v543_v16  ;;  %v566_v30 = vadd.f32 %v558_v22, %v544_v18  ;;  %v569_v31 = vmul.f32 %v568_v25, %v1788_v0  ;;  %v570_v62 = vmul.f32 %v568_v25, %v1792_v1  ;;  %s2264_s1 = sld [smem:[#allocation8 + $0x385]] }
  0x82   :  { %v571_v57 = vmul.f32 %v568_v25, %v1794_v2  ;;  %v572_v28 = vmul.f32 %v568_v25, %v1796_v3  ;;  %v2021_v36 = vadd.f32 %v1961_v63, %v1946_v60  ;;  %v2025_v44 = vadd.f32 %v1964_v50, %v1951_v5 }
  0x83   :  { %v2029_v49 = vadd.f32 %v1967_v4, %v1956_v6  ;;  %v590_v32 = vstv %s1993_s3  ;;  %v577_v33 = vrot.slane %v569_v31, 7  ;;  %v578_v34 = vrot.slane %v570_v62, 7  ;;  %s2280_s3 = sld [smem:[#allocation9 + $0x5]] }
  0x84   :  { %v579_v35 = vrot.slane %v571_v57, 7  ;;  %v580_v37 = vrot.slane %v572_v28, 7  ;;  %v611_v38 = vmul.f32 %v610_v17, %v1788_v0  ;;  %v612_v60 = vmul.f32 %v610_v17, %v1792_v1 }
  0x85   :  { %v613_v63 = vmul.f32 %v610_v17, %v1794_v2  ;;  %v616_v5 = vstv %s1999_s8  ;;  %v585_v50 = vadd.f32 %v577_v33, %v563_v26  ;;  %v586_v39 = vadd.f32 %v578_v34, %v564_v27  ;;  %s2282_s8 = sld [smem:[#allocation8 + $0x6]] }
  0x86   :  { %v587_v40 = vadd.f32 %v579_v35, %v565_v29  ;;  %v588_v6 = vadd.f32 %v580_v37, %v566_v30  ;;  %v617_v4 = vmul.f32 %v616_v5, %v1788_v0  ;;  %v618_v42 = vmul.f32 %v616_v5, %v1792_v1 }
  0x87   :  { %v619_v43 = vmul.f32 %v616_v5, %v1794_v2  ;;  %v620_v45 = vmul.f32 %v616_v5, %v1796_v3  ;;  %v591_v46 = vadd.f32 %v590_v32, %v585_v50  ;;  %v592_v47 = vadd.f32 %v590_v32, %v586_v39 }
  0x88   :  { %v614_v48 = vmul.f32 %v610_v17, %v1796_v3  ;;  %v638_v51 = vstv %s2009_s9  ;;  %v625_v52 = vrot.slane %v617_v4, 1  ;;  %v626_v53 = vrot.slane %v618_v42, 1  ;;  %s2288_s9 = sld [smem:[#allocation8 + $0x86]] }
  0x89   :  { %v627_v54 = vrot.slane %v619_v43, 1  ;;  %v628_v55 = vrot.slane %v620_v45, 1  ;;  %v593_v56 = vadd.f32 %v590_v32, %v587_v40  ;;  %v2044_v58 = vadd.f32 %v590_v32, %v588_v6 }
  0x8a   :  { %v595_v59 = vmax.f32 %v591_v46, 0.0  ;;  %v596_v7 = vmax.f32 %v592_v47, 0.0  ;;  %v2046_v8 = vadd.f32 %v424_v24, %v248_v23  ;;  %v2049_v61 = vstv %s2011_s10  ;;  %s2294_s10 = sld [smem:[#allocation10 + $0x5]] }
  0x8b   :  { %v660_v9 = vstv %s2017_s11  ;;  %v682_v10 = vstv %s2032_s12  ;;  %v633_v41 = vadd.f32 %v625_v52, %v611_v38  ;;  %v634_v11 = vadd.f32 %v626_v53, %v612_v60  ;;  %s2300_s11 = sld [smem:[#allocation8 + $0x106]] }
  0x8c   :  { %v635_v12 = vadd.f32 %v627_v54, %v613_v63  ;;  %v636_v13 = vadd.f32 %v628_v55, %v614_v48  ;;  %v639_v14 = vmul.f32 %v638_v51, %v1788_v0  ;;  %v640_v15 = vmul.f32 %v638_v51, %v1792_v1  ;;  %s2310_s12 = sld [smem:[#allocation8 + $0x186]] }
  0x8d   :  { %v641_v16 = vmul.f32 %v638_v51, %v1794_v2  ;;  %v642_v18 = vmul.f32 %v638_v51, %v1796_v3  ;;  %v597_v19 = vmax.f32 %v593_v56, 0.0  ;;  %v598_v20 = vmax.f32 %v2044_v58, 0.0 }
  0x8e   :  { %v2063_v21 = vmul.f32 %v2049_v61, %v595_v59  ;;  %v2066_v22 = vmul.f32 %v2049_v61, %v596_v7  ;;  %v647_v23 = vrot.slane %v639_v14, 2  ;;  %v648_v24 = vrot.slane %v640_v15, 2 }
  0x8f   :  { %v649_v25 = vrot.slane %v641_v16, 2  ;;  %v650_v17 = vrot.slane %v642_v18, 2  ;;  %v661_v26 = vmul.f32 %v660_v9, %v1788_v0  ;;  %v662_v27 = vmul.f32 %v660_v9, %v1792_v1 }
  0x90   :  { %v663_v29 = vmul.f32 %v660_v9, %v1794_v2  ;;  %v664_v30 = vmul.f32 %v660_v9, %v1796_v3  ;;  %v655_v31 = vadd.f32 %v647_v23, %v633_v41  ;;  %v656_v62 = vadd.f32 %v648_v24, %v634_v11 }
  0x91   :  { %v657_v57 = vadd.f32 %v649_v25, %v635_v12  ;;  %v658_v28 = vadd.f32 %v650_v17, %v636_v13  ;;  %v669_v32 = vrot.slane %v661_v26, 3  ;;  %v670_v33 = vrot.slane %v662_v27, 3 }
  0x92   :  { %v671_v34 = vrot.slane %v663_v29, 3  ;;  %v672_v35 = vrot.slane %v664_v30, 3  ;;  %v683_v37 = vmul.f32 %v682_v10, %v1788_v0  ;;  %v684_v38 = vmul.f32 %v682_v10, %v1792_v1 }
  0x93   :  { %v685_v60 = vmul.f32 %v682_v10, %v1794_v2  ;;  %v686_v63 = vmul.f32 %v682_v10, %v1796_v3  ;;  %v677_v5 = vadd.f32 %v669_v32, %v655_v31  ;;  %v678_v50 = vadd.f32 %v670_v33, %v656_v62 }
  0x94   :  { %v679_v39 = vadd.f32 %v671_v34, %v657_v57  ;;  %v680_v40 = vadd.f32 %v672_v35, %v658_v28  ;;  %v691_v6 = vrot.slane %v683_v37, 4  ;;  %v692_v4 = vrot.slane %v684_v38, 4 }
  0x95   :  { %v693_v42 = vrot.slane %v685_v60, 4  ;;  %v694_v43 = vrot.slane %v686_v63, 4  ;;  %v2079_v45 = vmul.f32 %v2049_v61, %v597_v19  ;;  %v704_v46 = vstv %s2053_s13  ;;  %s2312_s13 = sld [smem:[#allocation8 + $0x206]] }
  0x96   :  { %v726_v47 = vstv %s2059_s14  ;;  %v748_v48 = vstv %s2068_s15  ;;  %v699_v51 = vadd.f32 %v691_v6, %v677_v5  ;;  %v700_v52 = vadd.f32 %v692_v4, %v678_v50  ;;  %s2320_s14 = sld [smem:[#allocation8 + $0x286]] }
  0x97   :  { %v701_v53 = vadd.f32 %v693_v42, %v679_v39  ;;  %v702_v54 = vadd.f32 %v694_v43, %v680_v40  ;;  %v705_v55 = vmul.f32 %v704_v46, %v1788_v0  ;;  %v706_v56 = vmul.f32 %v704_v46, %v1792_v1  ;;  %s2324_s15 = sld [smem:[#allocation8 + $0x306]] }
  0x98   :  { %v707_v59 = vmul.f32 %v704_v46, %v1794_v2  ;;  %v708_v7 = vmul.f32 %v704_v46, %v1796_v3  ;;  %v727_v9 = vmul.f32 %v726_v47, %v1788_v0  ;;  %v728_v10 = vmul.f32 %v726_v47, %v1792_v1 }
  0x99   :  { %v729_v41 = vmul.f32 %v726_v47, %v1794_v2  ;;  %v730_v11 = vmul.f32 %v726_v47, %v1796_v3  ;;  %v713_v12 = vrot.slane %v705_v55, 5  ;;  %v714_v13 = vrot.slane %v706_v56, 5 }
  0x9a   :  { %v715_v14 = vrot.slane %v707_v59, 5  ;;  %v716_v15 = vrot.slane %v708_v7, 5  ;;  %v735_v16 = vrot.slane %v727_v9, 6  ;;  %v736_v18 = vrot.slane %v728_v10, 6 }
  0x9b   :  { %v737_v19 = vrot.slane %v729_v41, 6  ;;  %v738_v23 = vrot.slane %v730_v11, 6  ;;  %v721_v24 = vadd.f32 %v713_v12, %v699_v51  ;;  %v722_v25 = vadd.f32 %v714_v13, %v700_v52 }
  0x9c   :  { %v723_v17 = vadd.f32 %v715_v14, %v701_v53  ;;  %v724_v26 = vadd.f32 %v716_v15, %v702_v54  ;;  %v749_v27 = vmul.f32 %v748_v48, %v1788_v0  ;;  %v750_v29 = vmul.f32 %v748_v48, %v1792_v1 }
  0x9d   :  { %v751_v30 = vmul.f32 %v748_v48, %v1794_v2  ;;  %v752_v31 = vmul.f32 %v748_v48, %v1796_v3  ;;  %v743_v62 = vadd.f32 %v735_v16, %v721_v24  ;;  %v744_v57 = vadd.f32 %v736_v18, %v722_v25 }
  0x9e   :  { %v745_v28 = vadd.f32 %v737_v19, %v723_v17  ;;  %v746_v32 = vadd.f32 %v738_v23, %v724_v26  ;;  %v757_v33 = vrot.slane %v749_v27, 7  ;;  %v758_v34 = vrot.slane %v750_v29, 7 }
  0x9f   :  { %v759_v35 = vrot.slane %v751_v30, 7  ;;  %v760_v37 = vrot.slane %v752_v31, 7  ;;  %v2109_v38 = vmul.f32 %v2049_v61, %v598_v20  ;;  %v770_v60 = vstv %s2084_s16  ;;  %s2370_s16 = sld [smem:[#allocation8 + $0x386]] }
  0xa0   :  { %v790_v63 = vstv %s2086_s17  ;;  %v796_v5 = vstv %s2092_s18  ;;  %v765_v50 = vadd.f32 %v757_v33, %v743_v62  ;;  %v766_v39 = vadd.f32 %v758_v34, %v744_v57  ;;  %v2166_v57 = vld [vmem:[#allocation3] sm:$0xff]  ;;  %s2372_s17 = sld [smem:[#allocation8 + $0x7]] }
  0xa1   :  { %v767_v40 = vadd.f32 %v759_v35, %v745_v28  ;;  %v768_v6 = vadd.f32 %v760_v37, %v746_v32  ;;  %v2119_v4 = vstv %s2098_s19  ;;  %v791_v42 = vmul.f32 %v790_v63, %v1788_v0  ;;  %v2169_v32 = vld [vmem:[#allocation3 + $0x8] sm:$0xff]  ;;  %s2378_s18 = sld [smem:[#allocation8 + $0x87]] }
  0xa2   :  { %v792_v58 = vmul.f32 %v790_v63, %v1792_v1  ;;  %v793_v61 = vmul.f32 %v790_v63, %v1794_v2  ;;  %v771_v20 = vadd.f32 %v770_v60, %v765_v50  ;;  %v772_v43 = vadd.f32 %v770_v60, %v766_v39  ;;  %s2384_s19 = sld [smem:[#allocation9 + $0x6]] }
  0xa3   :  { %v773_v46 = vadd.f32 %v770_v60, %v767_v40  ;;  %v2126_v47 = vadd.f32 %v770_v60, %v768_v6  ;;  %v797_v48 = vmul.f32 %v796_v5, %v1788_v0  ;;  %v798_v51 = vmul.f32 %v796_v5, %v1792_v1 }
  0xa4   :  { %v799_v52 = vmul.f32 %v796_v5, %v1794_v2  ;;  %v800_v53 = vmul.f32 %v796_v5, %v1796_v3  ;;  %v775_v54 = vmax.f32 %v771_v20, 0.0  ;;  %v776_v55 = vmax.f32 %v772_v43, 0.0 }
  0xa5   :  { %v777_v56 = vmax.f32 %v773_v46, 0.0  ;;  %v794_v59 = vmul.f32 %v790_v63, %v1796_v3  ;;  %v805_v7 = vrot.slane %v797_v48, 1  ;;  %v806_v9 = vrot.slane %v798_v51, 1 }
  0xa6   :  { %v807_v10 = vrot.slane %v799_v52, 1  ;;  %v808_v41 = vrot.slane %v800_v53, 1  ;;  %v2137_v11 = vadd.f32 %v2063_v21, %v2021_v36  ;;  %v2141_v12 = vadd.f32 %v2066_v22, %v2025_v44 }
  0xa7   :  { %v2145_v13 = vadd.f32 %v2079_v45, %v2029_v49  ;;  %v818_v14 = vstv %s2104_s20  ;;  %v778_v15 = vmax.f32 %v2126_v47, 0.0  ;;  %v2150_v16 = vmul.f32 %v2119_v4, %v775_v54  ;;  %s2390_s20 = sld [smem:[#allocation8 + $0x107]] }
  0xa8   :  { %v2153_v36 = vmul.f32 %v2119_v4, %v776_v55  ;;  %v2156_v21 = vmul.f32 %v2119_v4, %v777_v56  ;;  %v813_v44 = vadd.f32 %v805_v7, %v791_v42  ;;  %v814_v22 = vadd.f32 %v806_v9, %v792_v58 }
  0xa9   :  { %v815_v18 = vadd.f32 %v807_v10, %v793_v61  ;;  %v816_v19 = vadd.f32 %v808_v41, %v794_v59  ;;  %v819_v49 = vmul.f32 %v818_v14, %v1788_v0  ;;  %v820_v45 = vmul.f32 %v818_v14, %v1792_v1  ;;  %v2172_v1 = vld [vmem:[#allocation3 + $0x10] sm:$0xff] }
  0xaa   :  { %v821_v23 = vmul.f32 %v818_v14, %v1794_v2  ;;  %v822_v24 = vmul.f32 %v818_v14, %v1796_v3  ;;  %v840_v25 = vstv %s2114_s21  ;;  %v862_v17 = vstv %s2116_s22  ;;  %v2175_v3 = vld [vmem:[#allocation3 + $0x18] sm:$0xff]  ;;  %s2392_s21 = sld [smem:[#allocation10 + $0x6]] }
  0xab   :  { %v884_v26 = vstv %s2124_s23  ;;  %v906_v27 = vstv %s2128_s24  ;;  %v827_v29 = vrot.slane %v819_v49, 2  ;;  %v828_v30 = vrot.slane %v820_v45, 2  ;;  %s2398_s22 = sld [smem:[#allocation8 + $0x187]] }
  0xac   :  { %v829_v31 = vrot.slane %v821_v23, 2  ;;  %v830_v62 = vrot.slane %v822_v24, 2  ;;  %v841_v28 = vmul.f32 %v2166_v57, %v840_v25  ;;  %v842_v0 = vmul.f32 %v2169_v32, %v840_v25  ;;  %s2415_s23 = sld [smem:[#allocation8 + $0x207]] }
  0xad   :  { %v843_v2 = vmul.f32 %v2172_v1, %v840_v25  ;;  %v844_v33 = vmul.f32 %v2175_v3, %v840_v25  ;;  %v835_v34 = vadd.f32 %v827_v29, %v813_v44  ;;  %v836_v35 = vadd.f32 %v828_v30, %v814_v22  ;;  %s2439_s24 = sld [smem:[#allocation8 + $0x287]] }
  0xae   :  { %v837_v37 = vadd.f32 %v829_v31, %v815_v18  ;;  %v838_v60 = vadd.f32 %v830_v62, %v816_v19  ;;  %v849_v63 = vrot.slane %v841_v28, 3  ;;  %v850_v5 = vrot.slane %v842_v0, 3 }
  0xaf   :  { %v851_v50 = vrot.slane %v843_v2, 3  ;;  %v852_v39 = vrot.slane %v844_v33, 3  ;;  %v863_v40 = vmul.f32 %v2166_v57, %v862_v17  ;;  %v864_v6 = vmul.f32 %v2169_v32, %v862_v17 }
  0xb0   :  { %v865_v42 = vmul.f32 %v2172_v1, %v862_v17  ;;  %v866_v58 = vmul.f32 %v2175_v3, %v862_v17  ;;  %v857_v61 = vadd.f32 %v849_v63, %v835_v34  ;;  %v858_v20 = vadd.f32 %v850_v5, %v836_v35 }
  0xb1   :  { %v859_v43 = vadd.f32 %v851_v50, %v837_v37  ;;  %v860_v46 = vadd.f32 %v852_v39, %v838_v60  ;;  %v871_v48 = vrot.slane %v863_v40, 4  ;;  %v872_v51 = vrot.slane %v864_v6, 4 }
  0xb2   :  { %v873_v52 = vrot.slane %v865_v42, 4  ;;  %v874_v53 = vrot.slane %v866_v58, 4  ;;  %v885_v54 = vmul.f32 %v2166_v57, %v884_v26  ;;  %v886_v55 = vmul.f32 %v2169_v32, %v884_v26 }
  0xb3   :  { %v887_v56 = vmul.f32 %v2172_v1, %v884_v26  ;;  %v888_v59 = vmul.f32 %v2175_v3, %v884_v26  ;;  %v879_v7 = vadd.f32 %v871_v48, %v857_v61  ;;  %v880_v9 = vadd.f32 %v872_v51, %v858_v20 }
  0xb4   :  { %v881_v10 = vadd.f32 %v873_v52, %v859_v43  ;;  %v882_v41 = vadd.f32 %v874_v53, %v860_v46  ;;  %v893_v14 = vrot.slane %v885_v54, 5  ;;  %v894_v44 = vrot.slane %v886_v55, 5 }
  0xb5   :  { %v895_v22 = vrot.slane %v887_v56, 5  ;;  %v896_v18 = vrot.slane %v888_v59, 5  ;;  %v907_v19 = vmul.f32 %v2166_v57, %v906_v27  ;;  %v908_v49 = vmul.f32 %v2169_v32, %v906_v27 }
  0xb6   :  { %v909_v45 = vmul.f32 %v2172_v1, %v906_v27  ;;  %v910_v23 = vmul.f32 %v2175_v3, %v906_v27  ;;  %v901_v24 = vadd.f32 %v893_v14, %v879_v7  ;;  %v902_v25 = vadd.f32 %v894_v44, %v880_v9 }
  0xb7   :  { %v903_v17 = vadd.f32 %v895_v22, %v881_v10  ;;  %v904_v26 = vadd.f32 %v896_v18, %v882_v41  ;;  %v915_v29 = vrot.slane %v907_v19, 6  ;;  %v916_v30 = vrot.slane %v908_v49, 6 }
  0xb8   :  { %v917_v31 = vrot.slane %v909_v45, 6  ;;  %v918_v62 = vrot.slane %v910_v23, 6  ;;  %v608_v28 = vadd.f32 %v2109_v38, %v2046_v8  ;;  %v784_v0 = vmul.f32 %v2119_v4, %v778_v15 }
  0xb9   :  { %v928_v2 = vstv %s2182_s25  ;;  %v970_v27 = vstv %s2184_s26  ;;  %v923_v33 = vadd.f32 %v915_v29, %v901_v24  ;;  %v924_v34 = vadd.f32 %v916_v30, %v902_v25  ;;  %s2445_s25 = sld [smem:[#allocation8 + $0x307]] }
  0xba   :  { %v925_v35 = vadd.f32 %v917_v31, %v903_v17  ;;  %v926_v37 = vadd.f32 %v918_v62, %v904_v26  ;;  %v929_v60 = vmul.f32 %v2166_v57, %v928_v2  ;;  %v930_v63 = vmul.f32 %v2169_v32, %v928_v2  ;;  %s2452_s26 = sld [smem:[#allocation8 + $0x387]] }
  0xbb   :  { %v931_v8 = vmul.f32 %v2172_v1, %v928_v2  ;;  %v932_v38 = vmul.f32 %v2175_v3, %v928_v2  ;;  %v2217_v4 = vadd.f32 %v2150_v16, %v2137_v11  ;;  %v2221_v47 = vadd.f32 %v2153_v36, %v2141_v12 }
  0xbc   :  { %v2225_v15 = vadd.f32 %v2156_v21, %v2145_v13  ;;  %v950_v5 = vstv %s2190_s27  ;;  %v937_v50 = vrot.slane %v929_v60, 7  ;;  %v938_v39 = vrot.slane %v930_v63, 7  ;;  %s2470_s27 = sld [smem:[#allocation9 + $0x7]] }
  0xbd   :  { %v939_v40 = vrot.slane %v931_v8, 7  ;;  %v940_v6 = vrot.slane %v932_v38, 7  ;;  %v971_v42 = vmul.f32 %v2166_v57, %v970_v27  ;;  %v972_v11 = vmul.f32 %v2169_v32, %v970_v27 }
  0xbe   :  { %v973_v16 = vmul.f32 %v2172_v1, %v970_v27  ;;  %v976_v12 = vstv %s2196_s28  ;;  %v945_v36 = vadd.f32 %v937_v50, %v923_v33  ;;  %v946_v58 = vadd.f32 %v938_v39, %v924_v34  ;;  %s2476_s28 = sld [smem:[#allocation10 + $0x7]] }
  0xbf   :  { %v947_v61 = vadd.f32 %v939_v40, %v925_v35  ;;  %v948_v13 = vadd.f32 %v940_v6, %v926_v37  ;;  %v977_v21 = vmul.f32 %v2166_v57, %v976_v12  ;;  %v978_v20 = vmul.f32 %v2169_v32, %v976_v12 }
  0xc0   :  { %v979_v43 = vmul.f32 %v2172_v1, %v976_v12  ;;  %v980_v46 = vmul.f32 %v2175_v3, %v976_v12  ;;  %v951_v48 = vadd.f32 %v950_v5, %v945_v36  ;;  %v952_v51 = vadd.f32 %v950_v5, %v946_v58 }
  0xc1   :  { %v974_v52 = vmul.f32 %v2175_v3, %v970_v27  ;;  %v998_v53 = vstv %s2205_s29  ;;  %v985_v54 = vrot.slane %v977_v21, 1  ;;  %v986_v55 = vrot.slane %v978_v20, 1 }
  0xc2   :  { %v987_v56 = vrot.slane %v979_v43, 1  ;;  %v988_v59 = vrot.slane %v980_v46, 1  ;;  %v953_v7 = vadd.f32 %v950_v5, %v947_v61  ;;  %v2240_v9 = vadd.f32 %v950_v5, %v948_v13 }
  0xc3   :  { %v955_v10 = vmax.f32 %v951_v48, 0.0  ;;  %v956_v41 = vmax.f32 %v952_v51, 0.0  ;;  %v2242_v14 = vadd.f32 %v784_v0, %v608_v28  ;;  %v2245_v44 = vstv %s2207_s2 }
  0xc4   :  { %v1020_v22 = vstv %s2213_s30  ;;  %v1042_v18 = vstv %s2228_s6  ;;  %v993_v19 = vadd.f32 %v985_v54, %v971_v42  ;;  %v994_v49 = vadd.f32 %v986_v55, %v972_v11  ;;  %s1741_s30 = smov [#allocation12]  }
  0xc5   :  { %v995_v45 = vadd.f32 %v987_v56, %v973_v16  ;;  %v996_v23 = vadd.f32 %v988_v59, %v974_v52  ;;  %v999_v24 = vmul.f32 %v2166_v57, %v998_v53  ;;  %v1000_v25 = vmul.f32 %v2169_v32, %v998_v53  ;;  %s1555_s6 = sshll.u32 %s1741_s30, 4  ;;  %s1556_s6 = int_to_ptr.vmem [resolvable:$true] %s1555_s6 }
  0xc6   :  { %v1001_v17 = vmul.f32 %v2172_v1, %v998_v53  ;;  %v1002_v26 = vmul.f32 %v2175_v3, %v998_v53  ;;  %v957_v29 = vmax.f32 %v953_v7, 0.0  ;;  %v958_v30 = vmax.f32 %v2240_v9, 0.0  ;;  %p1711_p2 = scmp.lt.s32.totalorder %s1556_s6, %s1556_s6 }
  0xc7   :  { %v2259_v31 = vmul.f32 %v2245_v44, %v955_v10  ;;  %v2262_v62 = vmul.f32 %v2245_v44, %v956_v41  ;;  %v1007_v28 = vrot.slane %v999_v24, 2  ;;  %v1008_v0 = vrot.slane %v1000_v25, 2 }
  0xc8   :  { %v1009_v2 = vrot.slane %v1001_v17, 2  ;;  %v1010_v27 = vrot.slane %v1002_v26, 2  ;;  %v1021_v33 = vmul.f32 %v2166_v57, %v1020_v22  ;;  %v1022_v34 = vmul.f32 %v2169_v32, %v1020_v22 }
  0xc9   :  { %v1023_v35 = vmul.f32 %v2172_v1, %v1020_v22  ;;  %v1024_v37 = vmul.f32 %v2175_v3, %v1020_v22  ;;  %v1015_v60 = vadd.f32 %v1007_v28, %v993_v19  ;;  %v1016_v63 = vadd.f32 %v1008_v0, %v994_v49 }
  0xca   :  { %v1017_v8 = vadd.f32 %v1009_v2, %v995_v45  ;;  %v1018_v38 = vadd.f32 %v1010_v27, %v996_v23  ;;  %v1029_v5 = vrot.slane %v1021_v33, 3  ;;  %v1030_v50 = vrot.slane %v1022_v34, 3 }
  0xcb   :  { %v1031_v39 = vrot.slane %v1023_v35, 3  ;;  %v1032_v40 = vrot.slane %v1024_v37, 3  ;;  %v1043_v6 = vmul.f32 %v2166_v57, %v1042_v18  ;;  %v1044_v42 = vmul.f32 %v2169_v32, %v1042_v18 }
  0xcc   :  { %v1045_v11 = vmul.f32 %v2172_v1, %v1042_v18  ;;  %v1046_v16 = vmul.f32 %v2175_v3, %v1042_v18  ;;  %v1037_v12 = vadd.f32 %v1029_v5, %v1015_v60  ;;  %v1038_v36 = vadd.f32 %v1030_v50, %v1016_v63 }
  0xcd   :  { %v1039_v58 = vadd.f32 %v1031_v39, %v1017_v8  ;;  %v1040_v61 = vadd.f32 %v1032_v40, %v1018_v38  ;;  %v1051_v13 = vrot.slane %v1043_v6, 4  ;;  %v1052_v21 = vrot.slane %v1044_v42, 4 }
  0xce   :  { %v1053_v20 = vrot.slane %v1045_v11, 4  ;;  %v1054_v43 = vrot.slane %v1046_v16, 4  ;;  %v2275_v46 = vmul.f32 %v2245_v44, %v957_v29  ;;  %v1064_v48 = vstv %s2249_s7 }
  0xcf   :  { %v1086_v51 = vstv %s2255_s0  ;;  %v1108_v52 = vstv %s2264_s1  ;;  %v1059_v53 = vadd.f32 %v1051_v13, %v1037_v12  ;;  %v1060_v54 = vadd.f32 %v1052_v21, %v1038_v36 }
  0xd0   :  { %v1061_v55 = vadd.f32 %v1053_v20, %v1039_v58  ;;  %v1062_v56 = vadd.f32 %v1054_v43, %v1040_v61  ;;  %v1065_v59 = vmul.f32 %v2166_v57, %v1064_v48  ;;  %v1066_v7 = vmul.f32 %v2169_v32, %v1064_v48 }
  0xd1   :  { %v1067_v10 = vmul.f32 %v2172_v1, %v1064_v48  ;;  %v1068_v41 = vmul.f32 %v2175_v3, %v1064_v48  ;;  %v1087_v22 = vmul.f32 %v2166_v57, %v1086_v51  ;;  %v1088_v18 = vmul.f32 %v2169_v32, %v1086_v51 }
  0xd2   :  { %v1089_v19 = vmul.f32 %v2172_v1, %v1086_v51  ;;  %v1090_v49 = vmul.f32 %v2175_v3, %v1086_v51  ;;  %v1073_v45 = vrot.slane %v1065_v59, 5  ;;  %v1074_v23 = vrot.slane %v1066_v7, 5 }
  0xd3   :  { %v1075_v24 = vrot.slane %v1067_v10, 5  ;;  %v1076_v25 = vrot.slane %v1068_v41, 5  ;;  %v1095_v17 = vrot.slane %v1087_v22, 6  ;;  %v1096_v26 = vrot.slane %v1088_v18, 6 }
  0xd4   :  { %v1097_v29 = vrot.slane %v1089_v19, 6  ;;  %v1098_v28 = vrot.slane %v1090_v49, 6  ;;  %v1081_v0 = vadd.f32 %v1073_v45, %v1059_v53  ;;  %v1082_v2 = vadd.f32 %v1074_v23, %v1060_v54 }
  0xd5   :  { %v1083_v27 = vadd.f32 %v1075_v24, %v1061_v55  ;;  %v1084_v33 = vadd.f32 %v1076_v25, %v1062_v56  ;;  %v1109_v34 = vmul.f32 %v2166_v57, %v1108_v52  ;;  %v1110_v35 = vmul.f32 %v2169_v32, %v1108_v52 }
  0xd6   :  { %v1111_v37 = vmul.f32 %v2172_v1, %v1108_v52  ;;  %v1112_v60 = vmul.f32 %v2175_v3, %v1108_v52  ;;  %v1103_v63 = vadd.f32 %v1095_v17, %v1081_v0  ;;  %v1104_v8 = vadd.f32 %v1096_v26, %v1082_v2 }
  0xd7   :  { %v1105_v38 = vadd.f32 %v1097_v29, %v1083_v27  ;;  %v1106_v5 = vadd.f32 %v1098_v28, %v1084_v33  ;;  %v1117_v50 = vrot.slane %v1109_v34, 7  ;;  %v1118_v39 = vrot.slane %v1110_v35, 7 }
  0xd8   :  { %v1119_v40 = vrot.slane %v1111_v37, 7  ;;  %v1120_v6 = vrot.slane %v1112_v60, 7  ;;  %v2305_v42 = vmul.f32 %v2245_v44, %v958_v30  ;;  %v1130_v11 = vstv %s2280_s3 }
  0xd9   :  { %v1150_v16 = vstv %s2282_s8  ;;  %v1156_v12 = vstv %s2288_s9  ;;  %v1125_v36 = vadd.f32 %v1117_v50, %v1103_v63  ;;  %v1126_v58 = vadd.f32 %v1118_v39, %v1104_v8 }
  0xda   :  { %v1127_v61 = vadd.f32 %v1119_v40, %v1105_v38  ;;  %v1128_v13 = vadd.f32 %v1120_v6, %v1106_v5  ;;  %v2315_v21 = vstv %s2294_s10  ;;  %v1151_v20 = vmul.f32 %v2166_v57, %v1150_v16 }
  0xdb   :  { %v1152_v9 = vmul.f32 %v2169_v32, %v1150_v16  ;;  %v1153_v44 = vmul.f32 %v2172_v1, %v1150_v16  ;;  %v1131_v30 = vadd.f32 %v1130_v11, %v1125_v36  ;;  %v1132_v43 = vadd.f32 %v1130_v11, %v1126_v58 }
  0xdc   :  { %v1133_v48 = vadd.f32 %v1130_v11, %v1127_v61  ;;  %v2322_v51 = vadd.f32 %v1130_v11, %v1128_v13  ;;  %v1157_v52 = vmul.f32 %v2166_v57, %v1156_v12  ;;  %v1158_v53 = vmul.f32 %v2169_v32, %v1156_v12 }
  0xdd   :  { %v1159_v54 = vmul.f32 %v2172_v1, %v1156_v12  ;;  %v1160_v55 = vmul.f32 %v2175_v3, %v1156_v12  ;;  %v1135_v56 = vmax.f32 %v1131_v30, 0.0  ;;  %v1136_v59 = vmax.f32 %v1132_v43, 0.0 }
  0xde   :  { %v1137_v7 = vmax.f32 %v1133_v48, 0.0  ;;  %v1154_v10 = vmul.f32 %v2175_v3, %v1150_v16  ;;  %v1165_v41 = vrot.slane %v1157_v52, 1  ;;  %v1166_v22 = vrot.slane %v1158_v53, 1 }
  0xdf   :  { %v1167_v18 = vrot.slane %v1159_v54, 1  ;;  %v1168_v19 = vrot.slane %v1160_v55, 1  ;;  %v2333_v49 = vadd.f32 %v2259_v31, %v2217_v4  ;;  %v2337_v45 = vadd.f32 %v2262_v62, %v2221_v47 }
  0xe0   :  { %v2341_v23 = vadd.f32 %v2275_v46, %v2225_v15  ;;  %v1178_v24 = vstv %s2300_s11  ;;  %v1138_v25 = vmax.f32 %v2322_v51, 0.0  ;;  %v2346_v17 = vmul.f32 %v2315_v21, %v1135_v56 }
  0xe1   :  { %v2349_v4 = vmul.f32 %v2315_v21, %v1136_v59  ;;  %v2352_v31 = vmul.f32 %v2315_v21, %v1137_v7  ;;  %v1173_v47 = vadd.f32 %v1165_v41, %v1151_v20  ;;  %v1174_v62 = vadd.f32 %v1166_v22, %v1152_v9 }
  0xe2   :  { %v1175_v26 = vadd.f32 %v1167_v18, %v1153_v44  ;;  %v1176_v29 = vadd.f32 %v1168_v19, %v1154_v10  ;;  %v1179_v15 = vmul.f32 %v2166_v57, %v1178_v24  ;;  %v1180_v46 = vmul.f32 %v2169_v32, %v1178_v24 }
  0xe3   :  { %v1181_v28 = vmul.f32 %v2172_v1, %v1178_v24  ;;  %v1182_v0 = vmul.f32 %v2175_v3, %v1178_v24  ;;  %v1200_v2 = vstv %s2310_s12  ;;  %v1222_v27 = vstv %s2312_s13 }
  0xe4   :  { %v1244_v33 = vstv %s2320_s14  ;;  %v1266_v34 = vstv %s2324_s15  ;;  %v1187_v35 = vrot.slane %v1179_v15, 2  ;;  %v1188_v37 = vrot.slane %v1180_v46, 2 }
  0xe5   :  { %v1189_v60 = vrot.slane %v1181_v28, 2  ;;  %v1190_v63 = vrot.slane %v1182_v0, 2  ;;  %v1201_v8 = vmul.f32 %v2166_v57, %v1200_v2  ;;  %v1202_v38 = vmul.f32 %v2169_v32, %v1200_v2 }
  0xe6   :  { %v1203_v5 = vmul.f32 %v2172_v1, %v1200_v2  ;;  %v1204_v50 = vmul.f32 %v2175_v3, %v1200_v2  ;;  %v1195_v39 = vadd.f32 %v1187_v35, %v1173_v47  ;;  %v1196_v40 = vadd.f32 %v1188_v37, %v1174_v62 }
  0xe7   :  { %v1197_v6 = vadd.f32 %v1189_v60, %v1175_v26  ;;  %v1198_v11 = vadd.f32 %v1190_v63, %v1176_v29  ;;  %v1209_v16 = vrot.slane %v1201_v8, 3  ;;  %v1210_v12 = vrot.slane %v1202_v38, 3 }
  0xe8   :  { %v1211_v36 = vrot.slane %v1203_v5, 3  ;;  %v1212_v58 = vrot.slane %v1204_v50, 3  ;;  %v1223_v61 = vmul.f32 %v2166_v57, %v1222_v27  ;;  %v1224_v13 = vmul.f32 %v2169_v32, %v1222_v27 }
  0xe9   :  { %v1225_v20 = vmul.f32 %v2172_v1, %v1222_v27  ;;  %v1226_v9 = vmul.f32 %v2175_v3, %v1222_v27  ;;  %v1217_v44 = vadd.f32 %v1209_v16, %v1195_v39  ;;  %v1218_v30 = vadd.f32 %v1210_v12, %v1196_v40 }
  0xea   :  { %v1219_v43 = vadd.f32 %v1211_v36, %v1197_v6  ;;  %v1220_v48 = vadd.f32 %v1212_v58, %v1198_v11  ;;  %v1231_v52 = vrot.slane %v1223_v61, 4  ;;  %v1232_v53 = vrot.slane %v1224_v13, 4 }
  0xeb   :  { %v1233_v54 = vrot.slane %v1225_v20, 4  ;;  %v1234_v55 = vrot.slane %v1226_v9, 4  ;;  %v1245_v56 = vmul.f32 %v2166_v57, %v1244_v33  ;;  %v1246_v59 = vmul.f32 %v2169_v32, %v1244_v33 }
  0xec   :  { %v1247_v7 = vmul.f32 %v2172_v1, %v1244_v33  ;;  %v1248_v10 = vmul.f32 %v2175_v3, %v1244_v33  ;;  %v1239_v41 = vadd.f32 %v1231_v52, %v1217_v44  ;;  %v1240_v22 = vadd.f32 %v1232_v53, %v1218_v30 }
  0xed   :  { %v1241_v18 = vadd.f32 %v1233_v54, %v1219_v43  ;;  %v1242_v19 = vadd.f32 %v1234_v55, %v1220_v48  ;;  %v1253_v24 = vrot.slane %v1245_v56, 5  ;;  %v1254_v47 = vrot.slane %v1246_v59, 5 }
  0xee   :  { %v1255_v62 = vrot.slane %v1247_v7, 5  ;;  %v1256_v26 = vrot.slane %v1248_v10, 5  ;;  %v1267_v29 = vmul.f32 %v2166_v57, %v1266_v34  ;;  %v1268_v15 = vmul.f32 %v2169_v32, %v1266_v34 }
  0xef   :  { %v1269_v46 = vmul.f32 %v2172_v1, %v1266_v34  ;;  %v1270_v28 = vmul.f32 %v2175_v3, %v1266_v34  ;;  %v1261_v0 = vadd.f32 %v1253_v24, %v1239_v41  ;;  %v1262_v2 = vadd.f32 %v1254_v47, %v1240_v22 }
  0xf0   :  { %v1263_v27 = vadd.f32 %v1255_v62, %v1241_v18  ;;  %v1264_v33 = vadd.f32 %v1256_v26, %v1242_v19  ;;  %v1275_v35 = vrot.slane %v1267_v29, 6  ;;  %v1276_v37 = vrot.slane %v1268_v15, 6 }
  0xf1   :  { %v1277_v60 = vrot.slane %v1269_v46, 6  ;;  %v1278_v63 = vrot.slane %v1270_v28, 6  ;;  %v968_v8 = vadd.f32 %v2305_v42, %v2242_v14  ;;  %v1288_v38 = vstv %s2370_s16 }
  0xf2   :  { %v1330_v5 = vstv %s2372_s17  ;;  %v1283_v50 = vadd.f32 %v1275_v35, %v1261_v0  ;;  %v1284_v39 = vadd.f32 %v1276_v37, %v1262_v2  ;;  %v1289_v6 = vmul.f32 %v2166_v57, %v1288_v38 }
  0xf3   :  { %v1285_v34 = vadd.f32 %v1277_v60, %v1263_v27  ;;  %v1286_v40 = vadd.f32 %v1278_v63, %v1264_v33  ;;  %v1290_v11 = vmul.f32 %v2169_v32, %v1288_v38  ;;  %v1291_v16 = vmul.f32 %v2172_v1, %v1288_v38 }
  0xf4   :  { %v1292_v14 = vmul.f32 %v2175_v3, %v1288_v38  ;;  %v1144_v42 = vmul.f32 %v2315_v21, %v1138_v25  ;;  %v2405_v12 = vadd.f32 %v2346_v17, %v2333_v49  ;;  %v2409_v36 = vadd.f32 %v2349_v4, %v2337_v45 }
  0xf5   :  { %v2413_v58 = vadd.f32 %v2352_v31, %v2341_v23  ;;  %v1297_v61 = vrot.slane %v1289_v6, 7  ;;  %v1298_v13 = vrot.slane %v1290_v11, 7  ;;  %v1299_v20 = vrot.slane %v1291_v16, 7 }
  0xf6   :  { %v1300_v51 = vrot.slane %v1292_v14, 7  ;;  %v1310_v21 = vstv %s2384_s19  ;;  %v1331_v25 = vmul.f32 %v2166_v57, %v1330_v5  ;;  %v1332_v49 = vmul.f32 %v2169_v32, %v1330_v5 }
  0xf7   :  { %v1336_v17 = vstv %s2378_s18  ;;  %v1305_v9 = vadd.f32 %v1297_v61, %v1283_v50  ;;  %v1306_v45 = vadd.f32 %v1298_v13, %v1284_v39  ;;  %v1307_v4 = vadd.f32 %v1299_v20, %v1285_v34 }
  0xf8   :  { %v1308_v44 = vadd.f32 %v1300_v51, %v1286_v40  ;;  %v1337_v23 = vmul.f32 %v2166_v57, %v1336_v17  ;;  %v1338_v31 = vmul.f32 %v2169_v32, %v1336_v17  ;;  %v1339_v30 = vmul.f32 %v2172_v1, %v1336_v17 }
  0xf9   :  { %v1340_v43 = vmul.f32 %v2175_v3, %v1336_v17  ;;  %v1311_v48 = vadd.f32 %v1310_v21, %v1305_v9  ;;  %v1333_v52 = vmul.f32 %v2172_v1, %v1330_v5  ;;  %v1334_v53 = vmul.f32 %v2175_v3, %v1330_v5 }
  0xfa   :  { %v1358_v54 = vstv %s2390_s20  ;;  %v1345_v55 = vrot.slane %v1337_v23, 1  ;;  %v1346_v56 = vrot.slane %v1338_v31, 1  ;;  %v1347_v59 = vrot.slane %v1339_v30, 1 }
  0xfb   :  { %v1348_v7 = vrot.slane %v1340_v43, 1  ;;  %v1312_v10 = vadd.f32 %v1310_v21, %v1306_v45  ;;  %v2428_v41 = vadd.f32 %v1310_v21, %v1307_v4  ;;  %v2430_v22 = vadd.f32 %v1310_v21, %v1308_v44 }
  0xfc   :  { %v1315_v18 = vmax.f32 %v1311_v48, 0.0  ;;  %v2432_v19 = vadd.f32 %v1144_v42, %v968_v8  ;;  %v2435_v24 = vstv %s2392_s21  ;;  %v1380_v47 = vstv %s2398_s22 }
  0xfd   :  { %v1402_v62 = vstv %s2415_s23  ;;  %v1353_v26 = vadd.f32 %v1345_v55, %v1331_v25  ;;  %v1354_v29 = vadd.f32 %v1346_v56, %v1332_v49  ;;  %v1355_v15 = vadd.f32 %v1347_v59, %v1333_v52 }
  0xfe   :  { %v1356_v46 = vadd.f32 %v1348_v7, %v1334_v53  ;;  %v1359_v28 = vmul.f32 %v2166_v57, %v1358_v54  ;;  %v1360_v0 = vmul.f32 %v2169_v32, %v1358_v54  ;;  %v1361_v2 = vmul.f32 %v2172_v1, %v1358_v54 }
  0xff   :  { %v1362_v27 = vmul.f32 %v2175_v3, %v1358_v54  ;;  %v1316_v33 = vmax.f32 %v1312_v10, 0.0  ;;  %v1317_v35 = vmax.f32 %v2428_v41, 0.0  ;;  %v1318_v37 = vmax.f32 %v2430_v22, 0.0 }
 0x100   :  { %v2450_v60 = vmul.f32 %v2435_v24, %v1315_v18  ;;  %v1367_v63 = vrot.slane %v1359_v28, 2  ;;  %v1368_v8 = vrot.slane %v1360_v0, 2  ;;  %v1369_v38 = vrot.slane %v1361_v2, 2 }
 0x101   :  { %v1370_v5 = vrot.slane %v1362_v27, 2  ;;  %v1381_v50 = vmul.f32 %v2166_v57, %v1380_v47  ;;  %v1382_v39 = vmul.f32 %v2169_v32, %v1380_v47  ;;  %v1383_v34 = vmul.f32 %v2172_v1, %v1380_v47 }
 0x102   :  { %v1384_v40 = vmul.f32 %v2175_v3, %v1380_v47  ;;  %v1375_v6 = vadd.f32 %v1367_v63, %v1353_v26  ;;  %v1376_v11 = vadd.f32 %v1368_v8, %v1354_v29  ;;  %v1377_v16 = vadd.f32 %v1369_v38, %v1355_v15 }
 0x103   :  { %v1378_v14 = vadd.f32 %v1370_v5, %v1356_v46  ;;  %v1389_v42 = vrot.slane %v1381_v50, 3  ;;  %v1390_v61 = vrot.slane %v1382_v39, 3  ;;  %v1391_v13 = vrot.slane %v1383_v34, 3 }
 0x104   :  { %v1392_v20 = vrot.slane %v1384_v40, 3  ;;  %v1403_v51 = vmul.f32 %v2166_v57, %v1402_v62  ;;  %v1404_v21 = vmul.f32 %v2169_v32, %v1402_v62  ;;  %v1405_v25 = vmul.f32 %v2172_v1, %v1402_v62 }
 0x105   :  { %v1406_v49 = vmul.f32 %v2175_v3, %v1402_v62  ;;  %v1397_v17 = vadd.f32 %v1389_v42, %v1375_v6  ;;  %v1398_v9 = vadd.f32 %v1390_v61, %v1376_v11  ;;  %v1399_v45 = vadd.f32 %v1391_v13, %v1377_v16 }
 0x106   :  { %v1400_v4 = vadd.f32 %v1392_v20, %v1378_v14  ;;  %v1411_v44 = vrot.slane %v1403_v51, 4  ;;  %v1412_v23 = vrot.slane %v1404_v21, 4  ;;  %v1413_v31 = vrot.slane %v1405_v25, 4 }
 0x107   :  { %v1414_v30 = vrot.slane %v1406_v49, 4  ;;  %v1322_v43 = vmul.f32 %v2435_v24, %v1316_v33  ;;  %v1424_v48 = vstv %s2439_s24  ;;  %v1446_v52 = vstv %s2445_s25 }
 0x108   :  { %v1468_v53 = vstv %s2452_s26  ;;  %v1419_v54 = vadd.f32 %v1411_v44, %v1397_v17  ;;  %v1420_v55 = vadd.f32 %v1412_v23, %v1398_v9  ;;  %v1421_v56 = vadd.f32 %v1413_v31, %v1399_v45 }
 0x109   :  { %v1422_v59 = vadd.f32 %v1414_v30, %v1400_v4  ;;  %v1425_v7 = vmul.f32 %v2166_v57, %v1424_v48  ;;  %v1426_v10 = vmul.f32 %v2169_v32, %v1424_v48  ;;  %v1427_v18 = vmul.f32 %v2172_v1, %v1424_v48 }
 0x10a   :  { %v1428_v47 = vmul.f32 %v2175_v3, %v1424_v48  ;;  %v1447_v62 = vmul.f32 %v2166_v57, %v1446_v52  ;;  %v1448_v26 = vmul.f32 %v2169_v32, %v1446_v52  ;;  %v1449_v29 = vmul.f32 %v2172_v1, %v1446_v52 }
 0x10b   :  { %v1450_v15 = vmul.f32 %v2175_v3, %v1446_v52  ;;  %v1433_v46 = vrot.slane %v1425_v7, 5  ;;  %v1434_v28 = vrot.slane %v1426_v10, 5  ;;  %v1435_v0 = vrot.slane %v1427_v18, 5 }
 0x10c   :  { %v1436_v2 = vrot.slane %v1428_v47, 5  ;;  %v1455_v27 = vrot.slane %v1447_v62, 6  ;;  %v1456_v33 = vrot.slane %v1448_v26, 6  ;;  %v1457_v63 = vrot.slane %v1449_v29, 6 }
 0x10d   :  { %v1458_v8 = vrot.slane %v1450_v15, 6  ;;  %v1441_v38 = vadd.f32 %v1433_v46, %v1419_v54  ;;  %v1442_v5 = vadd.f32 %v1434_v28, %v1420_v55  ;;  %v1443_v50 = vadd.f32 %v1435_v0, %v1421_v56 }
 0x10e   :  { %v1444_v39 = vadd.f32 %v1436_v2, %v1422_v59  ;;  %v1469_v34 = vmul.f32 %v2166_v57, %v1468_v53  ;;  %v1470_v40 = vmul.f32 %v2169_v32, %v1468_v53  ;;  %v1471_v6 = vmul.f32 %v2172_v1, %v1468_v53 }
 0x10f   :  { %v1472_v11 = vmul.f32 %v2175_v3, %v1468_v53  ;;  %v1463_v16 = vadd.f32 %v1455_v27, %v1441_v38  ;;  %v1464_v14 = vadd.f32 %v1456_v33, %v1442_v5  ;;  %v1465_v42 = vadd.f32 %v1457_v63, %v1443_v50 }
 0x110   :  { %v1466_v61 = vadd.f32 %v1458_v8, %v1444_v39  ;;  %v1477_v13 = vrot.slane %v1469_v34, 7  ;;  %v1478_v20 = vrot.slane %v1470_v40, 7  ;;  %v1479_v51 = vrot.slane %v1471_v6, 7 }
 0x111   :  { %v1480_v21 = vrot.slane %v1472_v11, 7  ;;  %v1323_v25 = vmul.f32 %v2435_v24, %v1317_v35  ;;  %v1324_v57 = vmul.f32 %v2435_v24, %v1318_v37  ;;  %v1490_v32 = vstv %s2470_s27 }
 0x112   :  { %v1485_v1 = vadd.f32 %v1477_v13, %v1463_v16  ;;  %v1486_v3 = vadd.f32 %v1478_v20, %v1464_v14  ;;  %v1487_v49 = vadd.f32 %v1479_v51, %v1465_v42  ;;  %v1325_v9 = vadd.f32 %v2450_v60, %v2405_v12 }
 0x113   :  { %v1488_v17 = vadd.f32 %v1480_v21, %v1466_v61  ;;  %v1740_v45 = vmov 1966171168   ;;  %v1524_v44 = vlaneseq  ;;  %v1326_v22 = vadd.f32 %v1322_v43, %v2409_v36 }
 0x114   :  { %v1522_v4 = vunpack.c.l.s4 %v1740_v45  ;;  %v1491_v23 = vadd.f32 %v1490_v32, %v1485_v1  ;;  %v1492_v41 = vadd.f32 %v1490_v32, %v1486_v3  ;;  %v1493_v31 = vadd.f32 %v1490_v32, %v1487_v49 }
 0x115   :  { %v1494_v35 = vadd.f32 %v1490_v32, %v1488_v17  ;;  %v1327_v24 = vadd.f32 %v1323_v25, %v2413_v58  ;;  %v1328_v37 = vadd.f32 %v1324_v57, %v2432_v19  ;;  %v1500_v30 = vstv %s2476_s28 }
 0x116   :  { %v1495_v48 = vmax.f32 %v1491_v23, 0.0  ;;  %v1496_v52 = vmax.f32 %v1492_v41, 0.0  ;;  %v1497_v53 = vmax.f32 %v1493_v31, 0.0  ;;  %v1523_v55 = vunpack.c.0.s8 %v1522_v4 }
 0x117   :  { %v1498_v54 = vmax.f32 %v1494_v35, 0.0  ;;  %v1525_v12 = vshrl.u32 %v1524_v44, 7  ;;  %v1510_v10 = vstv %s2505_s4  ;;  %vm1546_vm0 = vcmp.lt.s32.totalorder %v1524_v44, 512  ;;  %s1706_s4 = scalar_lea.vmem %s1556_s6, 64 }
 0x118   :  { %v1501_v60 = vmul.f32 %v1500_v30, %v1495_v48  ;;  %v1502_v56 = vmul.f32 %v1500_v30, %v1496_v52  ;;  %v1503_v59 = vmul.f32 %v1500_v30, %v1497_v53  ;;  %p1707_p1 = scmp.ne.s32.totalorder %s1556_s6, %s1706_s4  ;;  %p1712_p3 = scmp.lt.s32.totalorder %s1706_s4, %s1706_s4 }
 0x119   :  { %v1504_v7 = vmul.f32 %v1500_v30, %v1498_v54  ;;  %v1526_v19 = vsub.s32 %v1523_v55, %v1525_v12 }
 0x11a   :  { %v1505_v36 = vadd.f32 %v1501_v60, %v1325_v9  ;;  %v1506_v43 = vadd.f32 %v1502_v56, %v1326_v22  ;;  %v1507_v58 = vadd.f32 %v1503_v59, %v1327_v24  ;;  %p1713_p4 = por %p1712_p3, %p1711_p2 }
 0x11b   :  { %v1508_v18 = vadd.f32 %v1504_v7, %v1328_v37 }
 0x11c   :  { %v1511_v47 = vadd.f32 %v1510_v10, %v1505_v36  ;;  %v1512_v62 = vadd.f32 %v1510_v10, %v1506_v43  ;;  %v1513_v26 = vadd.f32 %v1510_v10, %v1507_v58  ;;  %p1714_p5 = pnand %p1713_p4, %p1707_p1 }
 0x11d   :  { %v1514_v29 = vadd.f32 %v1510_v10, %v1508_v18 }
 0x11e   :  { %v1519_v15 = vcombine.low %v1511_v47, %v1512_v62 }
 0x11f   :  { %v1520_v46 = vcombine.low %v1513_v26, %v1514_v29 }
 0x120   :  { %v1527_v28 = vrot.slane %v1519_v15, %v1526_v19 }
 0x121   :  { %v1534_v0 = vrot.slane %v1520_v46, %v1526_v19 }
 0x123   :  { %v1535_v2 = vcombine.low %v1527_v28, %v1534_v0 }
 0x125   :  { %v1542_v27 = vrot.slane %v1535_v2, %v1526_v19 }
 0x127   :  { %1548 = vst.msk [vmem:[#allocation12] sm:$0xf] %vm1546_vm0, %v1542_v27 }
 0x128   :  { %1717 = shalt.err (!%p1714_p5)
}
 0x129   :  { %1558 = dma.vmem_to_hbm [thread:$0]  %s1556_s6, 64, %s2506_s5, [#allocation5]  }
 0x12a   :  { %1734 = dma.done.wait [#allocation5], 64  }
 0x12b   :  { %1735 = vsyncadd [#allocation5], 4294967232 }
 0x12c   :  { %1562 = vsyncpa [#allocation4], 1 }
 0x12d   :  { %1563 = vsyncpa [#allocation5], 1 }
 0x12e   :  { %1564 = vsyncpa [#allocation6], 1 }
 0x12f   :  { %1565 = vsyncpa [#allocation7], 1 }
 0x130   :  { %1566 = vsyncpa [#allocation11], 1 }

</bundles_post_ra>
